<compile_context>
chip_gen: v6e
topology: v6e:2x2x1
jax: 0.10.0
libtpu: 0.0.40
codegen_flags: <defaults>
</compile_context>

<pallas_src>
import functools

import jax
import jax.numpy as jnp
from jax.experimental import pallas as pl
from jax.experimental.pallas import tpu as pltpu


# ---------------------------------------------------------------------------
# Fused kernel: QKV projection + windowed attention + output projection
# ---------------------------------------------------------------------------
def fused_sparse_attn_kernel(x_ref, wqkv_ref, bqkv_ref, wproj_ref, bproj_ref,
                             o_ref, ohs_ref, *, num_heads, window_size):
    _, N, C = x_ref.shape
    H = num_heads
    D = C // H
    Wsz = window_size
    nW = N // Wsz
    M = N // H        # output rows owned by each head under torch's reshape

    x = x_ref[0]                                                      # (N, C)

    # QKV projection (one MXU matmul); softmax scale pre-folded into the q columns.
    qkv = jnp.dot(x, wqkv_ref[...],
                  preferred_element_type=jnp.float32) + bqkv_ref[...]  # (N, 3C) f32

    bproj = bproj_ref[...]                                            # (1, C)
    out_blocks = []
    for h in range(H):  # H is small -> fully unrolled
        # Head h's q/k/v are contiguous D-wide lane slices ((3, H, D) column layout).
        qh = qkv[:, h * D:(h + 1) * D]                                # (N, D)
        kh = qkv[:, C + h * D:C + (h + 1) * D]                        # (N, D)
        vh = qkv[:, 2 * C + h * D:2 * C + (h + 1) * D]                # (N, D)

        # Window split: leading/sublane-group split only, lane dim untouched.
        qw = qh.reshape(nW, Wsz, D)
        kw = kh.reshape(nW, Wsz, D)
        vw = vh.reshape(nW, Wsz, D)

        # All windows of this head in one batched MXU contraction.
        s = jnp.einsum("nwd,nud->nwu", qw, kw,
                       preferred_element_type=jnp.float32)            # (nW, W, W)
        s = s - jnp.max(s, axis=-1, keepdims=True)
        p = jnp.exp(s)
        p = p * pl.reciprocal(jnp.sum(p, axis=-1, keepdims=True), approx=True)
        ow = jnp.einsum("nwu,nud->nwd", p, vw,
                        preferred_element_type=jnp.float32)           # (nW, W, D)

        # torch's (B, H, nW, W, D) -> (B, N, C) reshape is head-interleaved: head h owns
        # output rows [h*M, (h+1)*M) and output row r packs the H consecutive sequence
        # positions r*H + j (j = 0..H-1) across its C columns.  Stage the head output in
        # VMEM and apply the projection chunk-wise so no lane-rechunking reshape is
        # needed:   out_h = b_proj + sum_j oh[j::H, :] @ w_proj[j*D:(j+1)*D, :]
        ohs_ref[...] = ow.reshape(N, D)
        out_h = bproj
        for j in range(H):
            oh_j = ohs_ref[pl.ds(j, M, stride=H), :]                  # (M, D)
            out_h = out_h + jnp.dot(oh_j, wproj_ref[j * D:(j + 1) * D, :],
                                    preferred_element_type=jnp.float32)
        out_blocks.append(out_h)                                      # (M, C)

    # Single lane-dense store of the whole (N, C) slice of this batch element.
    o_ref[0] = jnp.concatenate(out_blocks, axis=0).astype(o_ref.dtype)


# ---------------------------------------------------------------------------
# Wrapper
# ---------------------------------------------------------------------------
def sparse_self_attention(x, params, num_heads, window_size):
    B, N, C = x.shape
    if N % window_size != 0:
        raise ValueError(
            f"Input sequence length N ({N}) must be divisible by "
            f"window_size ({window_size})")
    if C % num_heads != 0:
        raise ValueError("C must be divisible by num_heads")
    if N % num_heads != 0:
        raise ValueError("N must be divisible by num_heads (torch reshape semantics)")
    D = C // num_heads
    scale = D ** (-0.5)

    # Fold the softmax scale into the q columns of the QKV projection (free at trace
    # time; removes a per-window VPU multiply on the score tensor).
    w_qkv = jnp.concatenate(
        [params["w_qkv"][:, :C] * scale, params["w_qkv"][:, C:]], axis=1)
    b_qkv = jnp.concatenate(
        [params["b_qkv"][:, :C] * scale, params["b_qkv"][:, C:]], axis=1)

    kernel = functools.partial(fused_sparse_attn_kernel,
                               num_heads=num_heads, window_size=window_size)
    return pl.pallas_call(
        kernel,
        out_shape=jax.ShapeDtypeStruct((B, N, C), x.dtype),
        grid=(B,),
        in_specs=[
            pl.BlockSpec((1, N, C), lambda b: (b, 0, 0)),      # x (one batch / step)
            pl.BlockSpec((C, 3 * C), lambda b: (0, 0)),        # w_qkv (full, resident)
            pl.BlockSpec((1, 3 * C), lambda b: (0, 0)),        # b_qkv
            pl.BlockSpec((C, C), lambda b: (0, 0)),            # w_proj
            pl.BlockSpec((1, C), lambda b: (0, 0)),            # b_proj
        ],
        out_specs=pl.BlockSpec((1, N, C), lambda b: (b, 0, 0)),
        scratch_shapes=[pltpu.VMEM((N, D), jnp.float32)],      # per-head attn output
        compiler_params=pltpu.CompilerParams(
            dimension_semantics=("parallel",)),
    )(x, w_qkv, b_qkv, params["w_proj"], params["b_proj"])


# ---------------------------------------------------------------------------
# Pure-JAX reference (direct transcription of the PyTorch forward)
# ---------------------------------------------------------------------------
def reference_forward(x, params, num_heads, window_size):
    B, N, C = x.shape
    H = num_heads
    D = C // H
    nW = N // window_size
    scale = D ** (-0.5)
    qkv = x.reshape(B * N, C) @ params["w_qkv"] + params["b_qkv"]
    qkv = qkv.reshape(B, N, 3, H, D).transpose(2, 0, 3, 1, 4)
    q, k, v = qkv[0], qkv[1], qkv[2]
    q = q.reshape(B, H, nW, window_size, D)
    k = k.reshape(B, H, nW, window_size, D)
    v = v.reshape(B, H, nW, window_size, D)
    attn = jnp.einsum("bhnwd,bhnud->bhnwu", q, k) * scale
    attn = jax.nn.softmax(attn, axis=-1)
    o = jnp.einsum("bhnwu,bhnud->bhnwd", attn, v).reshape(B, N, C)
    return (o.reshape(B * N, C) @ params["w_proj"] + params["b_proj"]).reshape(B, N, C)


# ---------------------------------------------------------------------------
# Main
# ---------------------------------------------------------------------------
if __name__ == "__main__":
    B, N, dim = 2, 64, 32
    num_heads, window_size = 4, 8

    key = jax.random.PRNGKey(0)
    kx, k1, k2, k3, k4 = jax.random.split(key, 5)

    x = jax.random.normal(kx, (B, N, dim), dtype=jnp.float32)

    # Shapes match nn.Linear(dim, 3*dim) / nn.Linear(dim, dim), stored transposed
    # as (Cin, Cout) for y = x @ W + b.
    params = {
        "w_qkv":  0.05 * jax.random.normal(k1, (dim, 3 * dim), dtype=jnp.float32),
        "b_qkv":  0.01 * jax.random.normal(k2, (1, 3 * dim), dtype=jnp.float32),
        "w_proj": 0.05 * jax.random.normal(k3, (dim, dim), dtype=jnp.float32),
        "b_proj": 0.01 * jax.random.normal(k4, (1, dim), dtype=jnp.float32),
    }

    out = sparse_self_attention(x, params, num_heads, window_size)
    out = jax.block_until_ready(out)

    ref = reference_forward(x, params, num_heads, window_size)
    assert out.shape == (B, N, dim)
    max_err = jnp.max(jnp.abs(out - ref))
    # Tolerance loosened slightly to cover pl.reciprocal(approx=True) in the softmax.
    assert jnp.allclose(out, ref, atol=5e-3, rtol=1e-2), (
        f"mismatch vs reference, max abs err = {max_err}")

    print("KERNEL_OK")
</pallas_src>

<mosaic_0001>
module attributes {stable_mosaic.version = 11 : i64} {
  func.func @fused_sparse_attn_kernel(%arg0: i32, %arg1: memref<1x64x32xf32, #tpu.memory_space<vmem>>, %arg2: memref<32x96xf32, #tpu.memory_space<vmem>>, %arg3: memref<1x96xf32, #tpu.memory_space<vmem>>, %arg4: memref<32x32xf32, #tpu.memory_space<vmem>>, %arg5: memref<1x32xf32, #tpu.memory_space<vmem>>, %arg6: memref<1x64x32xf32, #tpu.memory_space<vmem>>, %arg7: memref<64x8xf32, #tpu.memory_space<vmem>>) attributes {dimension_semantics = [#tpu.dimension_semantics<parallel>], iteration_bounds = array<i64: 2>, scalar_prefetch = 0 : i64, scratch_operands = 1 : i64, tpu.core_type = #tpu.core_type<tc>, window_params = [{transform_indices = @transform_0, window_bounds = array<i64: 1, 64, 32>}, {pipeline_mode = #tpu.pipeline_mode<synchronous>, transform_indices = @transform_1, window_bounds = array<i64: 32, 96>}, {pipeline_mode = #tpu.pipeline_mode<synchronous>, transform_indices = @transform_2, window_bounds = array<i64: 1, 96>}, {pipeline_mode = #tpu.pipeline_mode<synchronous>, transform_indices = @transform_3, window_bounds = array<i64: 32, 32>}, {pipeline_mode = #tpu.pipeline_mode<synchronous>, transform_indices = @transform_4, window_bounds = array<i64: 1, 32>}, {transform_indices = @transform_5, window_bounds = array<i64: 1, 64, 32>}]} {
    %c0 = arith.constant 0 : index
    %c0_0 = arith.constant 0 : index
    %c0_1 = arith.constant 0 : index
    %0 = vector.load %arg1[%c0, %c0_0, %c0_1] : memref<1x64x32xf32, #tpu.memory_space<vmem>>, vector<1x64x32xf32>
    %1 = vector.shape_cast %0 : vector<1x64x32xf32> to vector<64x32xf32>
    %c0_2 = arith.constant 0 : index
    %c0_3 = arith.constant 0 : index
    %2 = vector.load %arg2[%c0_2, %c0_3] : memref<32x96xf32, #tpu.memory_space<vmem>>, vector<32x96xf32>
    %cst = arith.constant dense<0.000000e+00> : vector<64x96xf32>
    %3 = tpu.matmul %1, %2, %cst {dimension_numbers = #tpu.dot_dimension_numbers<[1], [0], [0], [1], [0, 0, 1, 1], [], []>} : vector<64x32xf32>, vector<32x96xf32>, vector<64x96xf32> -> vector<64x96xf32>
    %c0_4 = arith.constant 0 : index
    %c0_5 = arith.constant 0 : index
    %4 = vector.load %arg3[%c0_4, %c0_5] : memref<1x96xf32, #tpu.memory_space<vmem>>, vector<1x96xf32>
    %5 = vector.broadcast %4 : vector<1x96xf32> to vector<64x96xf32>
    %6 = arith.addf %3, %5 : vector<64x96xf32>
    %c0_6 = arith.constant 0 : index
    %c0_7 = arith.constant 0 : index
    %7 = vector.load %arg5[%c0_6, %c0_7] : memref<1x32xf32, #tpu.memory_space<vmem>>, vector<1x32xf32>
    %8 = vector.extract_strided_slice %6 {offsets = [0, 0], sizes = [64, 8], strides = [1, 1]} : vector<64x96xf32> to vector<64x8xf32>
    %9 = vector.extract_strided_slice %6 {offsets = [0, 32], sizes = [64, 8], strides = [1, 1]} : vector<64x96xf32> to vector<64x8xf32>
    %10 = vector.extract_strided_slice %6 {offsets = [0, 64], sizes = [64, 8], strides = [1, 1]} : vector<64x96xf32> to vector<64x8xf32>
    %11 = vector.shape_cast %8 : vector<64x8xf32> to vector<8x8x8xf32>
    %12 = vector.shape_cast %9 : vector<64x8xf32> to vector<8x8x8xf32>
    %13 = vector.shape_cast %10 : vector<64x8xf32> to vector<8x8x8xf32>
    "tpu.trace_start"() <{level = 10 : i32, message = "nwd,nud->nwu"}> : () -> ()
    %cst_8 = arith.constant dense<0.000000e+00> : vector<8x8x8xf32>
    %14 = tpu.matmul %11, %12, %cst_8 {dimension_numbers = #tpu.dot_dimension_numbers<[2], [2], [1], [1], [0, 0, 0, 1, 1, 1], [0], [0]>} : vector<8x8x8xf32>, vector<8x8x8xf32>, vector<8x8x8xf32> -> vector<8x8x8xf32>
    "tpu.trace_stop"() : () -> ()
    %cst_9 = arith.constant dense<0xFF800000> : vector<8x8xf32>
    %15 = vector.multi_reduction <maximumf>, %14, %cst_9 [2] : vector<8x8x8xf32> to vector<8x8xf32>
    %16 = vector.shape_cast %15 : vector<8x8xf32> to vector<8x8x1xf32>
    %17 = vector.broadcast %16 : vector<8x8x1xf32> to vector<8x8x8xf32>
    %18 = arith.subf %14, %17 : vector<8x8x8xf32>
    %19 = math.exp %18 : vector<8x8x8xf32>
    %cst_10 = arith.constant dense<0.000000e+00> : vector<8x8xf32>
    %20 = vector.multi_reduction <add>, %19, %cst_10 [2] : vector<8x8x8xf32> to vector<8x8xf32>
    %21 = vector.shape_cast %20 : vector<8x8xf32> to vector<8x8x1xf32>
    %22 = tpu.reciprocal %21 {approx = true} : vector<8x8x1xf32> -> vector<8x8x1xf32>
    %23 = vector.broadcast %22 : vector<8x8x1xf32> to vector<8x8x8xf32>
    %24 = arith.mulf %19, %23 : vector<8x8x8xf32>
    "tpu.trace_start"() <{level = 10 : i32, message = "nwu,nud->nwd"}> : () -> ()
    %cst_11 = arith.constant dense<0.000000e+00> : vector<8x8x8xf32>
    %25 = tpu.matmul %24, %13, %cst_11 {dimension_numbers = #tpu.dot_dimension_numbers<[2], [1], [1], [2], [0, 0, 0, 1, 1, 2], [0], [0]>} : vector<8x8x8xf32>, vector<8x8x8xf32>, vector<8x8x8xf32> -> vector<8x8x8xf32>
    "tpu.trace_stop"() : () -> ()
    %26 = vector.shape_cast %25 : vector<8x8x8xf32> to vector<64x8xf32>
    %c0_12 = arith.constant 0 : index
    %c0_13 = arith.constant 0 : index
    %27 = vector.load %arg7[%c0_12, %c0_13] : memref<64x8xf32, #tpu.memory_space<vmem>>, vector<64x8xf32>
    tpu.vector_store %arg7[%c0_12, %c0_13], %26 {strides = array<i32>} : memref<64x8xf32, #tpu.memory_space<vmem>>, vector<64x8xf32>,
    %c0_14 = arith.constant 0 : index
    %c0_15 = arith.constant 0 : index
    %28 = tpu.strided_load %arg7[%c0_14, %c0_15] {strides = array<i32: 4, 1>} : memref<64x8xf32, #tpu.memory_space<vmem>>, vector<16x8xf32>
    %c0_16 = arith.constant 0 : index
    %c0_17 = arith.constant 0 : index
    %29 = vector.load %arg4[%c0_16, %c0_17] : memref<32x32xf32, #tpu.memory_space<vmem>>, vector<8x32xf32>
    %cst_18 = arith.constant dense<0.000000e+00> : vector<16x32xf32>
    %30 = tpu.matmul %28, %29, %cst_18 {dimension_numbers = #tpu.dot_dimension_numbers<[1], [0], [0], [1], [0, 0, 1, 1], [], []>} : vector<16x8xf32>, vector<8x32xf32>, vector<16x32xf32> -> vector<16x32xf32>
    %31 = vector.broadcast %7 : vector<1x32xf32> to vector<16x32xf32>
    %32 = arith.addf %31, %30 : vector<16x32xf32>
    %c1 = arith.constant 1 : index
    %c0_19 = arith.constant 0 : index
    %33 = tpu.strided_load %arg7[%c1, %c0_19] {strides = array<i32: 4, 1>} : memref<64x8xf32, #tpu.memory_space<vmem>>, vector<16x8xf32>
    %c8 = arith.constant 8 : index
    %c0_20 = arith.constant 0 : index
    %34 = vector.load %arg4[%c8, %c0_20] : memref<32x32xf32, #tpu.memory_space<vmem>>, vector<8x32xf32>
    %cst_21 = arith.constant dense<0.000000e+00> : vector<16x32xf32>
    %35 = tpu.matmul %33, %34, %cst_21 {dimension_numbers = #tpu.dot_dimension_numbers<[1], [0], [0], [1], [0, 0, 1, 1], [], []>} : vector<16x8xf32>, vector<8x32xf32>, vector<16x32xf32> -> vector<16x32xf32>
    %36 = arith.addf %32, %35 : vector<16x32xf32>
    %c2 = arith.constant 2 : index
    %c0_22 = arith.constant 0 : index
    %37 = tpu.strided_load %arg7[%c2, %c0_22] {strides = array<i32: 4, 1>} : memref<64x8xf32, #tpu.memory_space<vmem>>, vector<16x8xf32>
    %c16 = arith.constant 16 : index
    %c0_23 = arith.constant 0 : index
    %38 = vector.load %arg4[%c16, %c0_23] : memref<32x32xf32, #tpu.memory_space<vmem>>, vector<8x32xf32>
    %cst_24 = arith.constant dense<0.000000e+00> : vector<16x32xf32>
    %39 = tpu.matmul %37, %38, %cst_24 {dimension_numbers = #tpu.dot_dimension_numbers<[1], [0], [0], [1], [0, 0, 1, 1], [], []>} : vector<16x8xf32>, vector<8x32xf32>, vector<16x32xf32> -> vector<16x32xf32>
    %40 = arith.addf %36, %39 : vector<16x32xf32>
    %c3 = arith.constant 3 : index
    %c0_25 = arith.constant 0 : index
    %41 = tpu.strided_load %arg7[%c3, %c0_25] {strides = array<i32: 4, 1>} : memref<64x8xf32, #tpu.memory_space<vmem>>, vector<16x8xf32>
    %c24 = arith.constant 24 : index
    %c0_26 = arith.constant 0 : index
    %42 = vector.load %arg4[%c24, %c0_26] : memref<32x32xf32, #tpu.memory_space<vmem>>, vector<8x32xf32>
    %cst_27 = arith.constant dense<0.000000e+00> : vector<16x32xf32>
    %43 = tpu.matmul %41, %42, %cst_27 {dimension_numbers = #tpu.dot_dimension_numbers<[1], [0], [0], [1], [0, 0, 1, 1], [], []>} : vector<16x8xf32>, vector<8x32xf32>, vector<16x32xf32> -> vector<16x32xf32>
    %44 = arith.addf %40, %43 : vector<16x32xf32>
    %45 = vector.extract_strided_slice %6 {offsets = [0, 8], sizes = [64, 8], strides = [1, 1]} : vector<64x96xf32> to vector<64x8xf32>
    %46 = vector.extract_strided_slice %6 {offsets = [0, 40], sizes = [64, 8], strides = [1, 1]} : vector<64x96xf32> to vector<64x8xf32>
    %47 = vector.extract_strided_slice %6 {offsets = [0, 72], sizes = [64, 8], strides = [1, 1]} : vector<64x96xf32> to vector<64x8xf32>
    %48 = vector.shape_cast %45 : vector<64x8xf32> to vector<8x8x8xf32>
    %49 = vector.shape_cast %46 : vector<64x8xf32> to vector<8x8x8xf32>
    %50 = vector.shape_cast %47 : vector<64x8xf32> to vector<8x8x8xf32>
    "tpu.trace_start"() <{level = 10 : i32, message = "nwd,nud->nwu"}> : () -> ()
    %cst_28 = arith.constant dense<0.000000e+00> : vector<8x8x8xf32>
    %51 = tpu.matmul %48, %49, %cst_28 {dimension_numbers = #tpu.dot_dimension_numbers<[2], [2], [1], [1], [0, 0, 0, 1, 1, 1], [0], [0]>} : vector<8x8x8xf32>, vector<8x8x8xf32>, vector<8x8x8xf32> -> vector<8x8x8xf32>
    "tpu.trace_stop"() : () -> ()
    %cst_29 = arith.constant dense<0xFF800000> : vector<8x8xf32>
    %52 = vector.multi_reduction <maximumf>, %51, %cst_29 [2] : vector<8x8x8xf32> to vector<8x8xf32>
    %53 = vector.shape_cast %52 : vector<8x8xf32> to vector<8x8x1xf32>
    %54 = vector.broadcast %53 : vector<8x8x1xf32> to vector<8x8x8xf32>
    %55 = arith.subf %51, %54 : vector<8x8x8xf32>
    %56 = math.exp %55 : vector<8x8x8xf32>
    %cst_30 = arith.constant dense<0.000000e+00> : vector<8x8xf32>
    %57 = vector.multi_reduction <add>, %56, %cst_30 [2] : vector<8x8x8xf32> to vector<8x8xf32>
    %58 = vector.shape_cast %57 : vector<8x8xf32> to vector<8x8x1xf32>
    %59 = tpu.reciprocal %58 {approx = true} : vector<8x8x1xf32> -> vector<8x8x1xf32>
    %60 = vector.broadcast %59 : vector<8x8x1xf32> to vector<8x8x8xf32>
    %61 = arith.mulf %56, %60 : vector<8x8x8xf32>
    "tpu.trace_start"() <{level = 10 : i32, message = "nwu,nud->nwd"}> : () -> ()
    %cst_31 = arith.constant dense<0.000000e+00> : vector<8x8x8xf32>
    %62 = tpu.matmul %61, %50, %cst_31 {dimension_numbers = #tpu.dot_dimension_numbers<[2], [1], [1], [2], [0, 0, 0, 1, 1, 2], [0], [0]>} : vector<8x8x8xf32>, vector<8x8x8xf32>, vector<8x8x8xf32> -> vector<8x8x8xf32>
    "tpu.trace_stop"() : () -> ()
    %63 = vector.shape_cast %62 : vector<8x8x8xf32> to vector<64x8xf32>
    %c0_32 = arith.constant 0 : index
    %c0_33 = arith.constant 0 : index
    %64 = vector.load %arg7[%c0_32, %c0_33] : memref<64x8xf32, #tpu.memory_space<vmem>>, vector<64x8xf32>
    tpu.vector_store %arg7[%c0_32, %c0_33], %63 {strides = array<i32>} : memref<64x8xf32, #tpu.memory_space<vmem>>, vector<64x8xf32>,
    %c0_34 = arith.constant 0 : index
    %c0_35 = arith.constant 0 : index
    %65 = tpu.strided_load %arg7[%c0_34, %c0_35] {strides = array<i32: 4, 1>} : memref<64x8xf32, #tpu.memory_space<vmem>>, vector<16x8xf32>
    %c0_36 = arith.constant 0 : index
    %c0_37 = arith.constant 0 : index
    %66 = vector.load %arg4[%c0_36, %c0_37] : memref<32x32xf32, #tpu.memory_space<vmem>>, vector<8x32xf32>
    %cst_38 = arith.constant dense<0.000000e+00> : vector<16x32xf32>
    %67 = tpu.matmul %65, %66, %cst_38 {dimension_numbers = #tpu.dot_dimension_numbers<[1], [0], [0], [1], [0, 0, 1, 1], [], []>} : vector<16x8xf32>, vector<8x32xf32>, vector<16x32xf32> -> vector<16x32xf32>
    %68 = vector.broadcast %7 : vector<1x32xf32> to vector<16x32xf32>
    %69 = arith.addf %68, %67 : vector<16x32xf32>
    %c1_39 = arith.constant 1 : index
    %c0_40 = arith.constant 0 : index
    %70 = tpu.strided_load %arg7[%c1_39, %c0_40] {strides = array<i32: 4, 1>} : memref<64x8xf32, #tpu.memory_space<vmem>>, vector<16x8xf32>
    %c8_41 = arith.constant 8 : index
    %c0_42 = arith.constant 0 : index
    %71 = vector.load %arg4[%c8_41, %c0_42] : memref<32x32xf32, #tpu.memory_space<vmem>>, vector<8x32xf32>
    %cst_43 = arith.constant dense<0.000000e+00> : vector<16x32xf32>
    %72 = tpu.matmul %70, %71, %cst_43 {dimension_numbers = #tpu.dot_dimension_numbers<[1], [0], [0], [1], [0, 0, 1, 1], [], []>} : vector<16x8xf32>, vector<8x32xf32>, vector<16x32xf32> -> vector<16x32xf32>
    %73 = arith.addf %69, %72 : vector<16x32xf32>
    %c2_44 = arith.constant 2 : index
    %c0_45 = arith.constant 0 : index
    %74 = tpu.strided_load %arg7[%c2_44, %c0_45] {strides = array<i32: 4, 1>} : memref<64x8xf32, #tpu.memory_space<vmem>>, vector<16x8xf32>
    %c16_46 = arith.constant 16 : index
    %c0_47 = arith.constant 0 : index
    %75 = vector.load %arg4[%c16_46, %c0_47] : memref<32x32xf32, #tpu.memory_space<vmem>>, vector<8x32xf32>
    %cst_48 = arith.constant dense<0.000000e+00> : vector<16x32xf32>
    %76 = tpu.matmul %74, %75, %cst_48 {dimension_numbers = #tpu.dot_dimension_numbers<[1], [0], [0], [1], [0, 0, 1, 1], [], []>} : vector<16x8xf32>, vector<8x32xf32>, vector<16x32xf32> -> vector<16x32xf32>
    %77 = arith.addf %73, %76 : vector<16x32xf32>
    %c3_49 = arith.constant 3 : index
    %c0_50 = arith.constant 0 : index
    %78 = tpu.strided_load %arg7[%c3_49, %c0_50] {strides = array<i32: 4, 1>} : memref<64x8xf32, #tpu.memory_space<vmem>>, vector<16x8xf32>
    %c24_51 = arith.constant 24 : index
    %c0_52 = arith.constant 0 : index
    %79 = vector.load %arg4[%c24_51, %c0_52] : memref<32x32xf32, #tpu.memory_space<vmem>>, vector<8x32xf32>
    %cst_53 = arith.constant dense<0.000000e+00> : vector<16x32xf32>
    %80 = tpu.matmul %78, %79, %cst_53 {dimension_numbers = #tpu.dot_dimension_numbers<[1], [0], [0], [1], [0, 0, 1, 1], [], []>} : vector<16x8xf32>, vector<8x32xf32>, vector<16x32xf32> -> vector<16x32xf32>
    %81 = arith.addf %77, %80 : vector<16x32xf32>
    %82 = vector.extract_strided_slice %6 {offsets = [0, 16], sizes = [64, 8], strides = [1, 1]} : vector<64x96xf32> to vector<64x8xf32>
    %83 = vector.extract_strided_slice %6 {offsets = [0, 48], sizes = [64, 8], strides = [1, 1]} : vector<64x96xf32> to vector<64x8xf32>
    %84 = vector.extract_strided_slice %6 {offsets = [0, 80], sizes = [64, 8], strides = [1, 1]} : vector<64x96xf32> to vector<64x8xf32>
    %85 = vector.shape_cast %82 : vector<64x8xf32> to vector<8x8x8xf32>
    %86 = vector.shape_cast %83 : vector<64x8xf32> to vector<8x8x8xf32>
    %87 = vector.shape_cast %84 : vector<64x8xf32> to vector<8x8x8xf32>
    "tpu.trace_start"() <{level = 10 : i32, message = "nwd,nud->nwu"}> : () -> ()
    %cst_54 = arith.constant dense<0.000000e+00> : vector<8x8x8xf32>
    %88 = tpu.matmul %85, %86, %cst_54 {dimension_numbers = #tpu.dot_dimension_numbers<[2], [2], [1], [1], [0, 0, 0, 1, 1, 1], [0], [0]>} : vector<8x8x8xf32>, vector<8x8x8xf32>, vector<8x8x8xf32> -> vector<8x8x8xf32>
    "tpu.trace_stop"() : () -> ()
    %cst_55 = arith.constant dense<0xFF800000> : vector<8x8xf32>
    %89 = vector.multi_reduction <maximumf>, %88, %cst_55 [2] : vector<8x8x8xf32> to vector<8x8xf32>
    %90 = vector.shape_cast %89 : vector<8x8xf32> to vector<8x8x1xf32>
    %91 = vector.broadcast %90 : vector<8x8x1xf32> to vector<8x8x8xf32>
    %92 = arith.subf %88, %91 : vector<8x8x8xf32>
    %93 = math.exp %92 : vector<8x8x8xf32>
    %cst_56 = arith.constant dense<0.000000e+00> : vector<8x8xf32>
    %94 = vector.multi_reduction <add>, %93, %cst_56 [2] : vector<8x8x8xf32> to vector<8x8xf32>
    %95 = vector.shape_cast %94 : vector<8x8xf32> to vector<8x8x1xf32>
    %96 = tpu.reciprocal %95 {approx = true} : vector<8x8x1xf32> -> vector<8x8x1xf32>
    %97 = vector.broadcast %96 : vector<8x8x1xf32> to vector<8x8x8xf32>
    %98 = arith.mulf %93, %97 : vector<8x8x8xf32>
    "tpu.trace_start"() <{level = 10 : i32, message = "nwu,nud->nwd"}> : () -> ()
    %cst_57 = arith.constant dense<0.000000e+00> : vector<8x8x8xf32>
    %99 = tpu.matmul %98, %87, %cst_57 {dimension_numbers = #tpu.dot_dimension_numbers<[2], [1], [1], [2], [0, 0, 0, 1, 1, 2], [0], [0]>} : vector<8x8x8xf32>, vector<8x8x8xf32>, vector<8x8x8xf32> -> vector<8x8x8xf32>
    "tpu.trace_stop"() : () -> ()
    %100 = vector.shape_cast %99 : vector<8x8x8xf32> to vector<64x8xf32>
    %c0_58 = arith.constant 0 : index
    %c0_59 = arith.constant 0 : index
    %101 = vector.load %arg7[%c0_58, %c0_59] : memref<64x8xf32, #tpu.memory_space<vmem>>, vector<64x8xf32>
    tpu.vector_store %arg7[%c0_58, %c0_59], %100 {strides = array<i32>} : memref<64x8xf32, #tpu.memory_space<vmem>>, vector<64x8xf32>,
    %c0_60 = arith.constant 0 : index
    %c0_61 = arith.constant 0 : index
    %102 = tpu.strided_load %arg7[%c0_60, %c0_61] {strides = array<i32: 4, 1>} : memref<64x8xf32, #tpu.memory_space<vmem>>, vector<16x8xf32>
    %c0_62 = arith.constant 0 : index
    %c0_63 = arith.constant 0 : index
    %103 = vector.load %arg4[%c0_62, %c0_63] : memref<32x32xf32, #tpu.memory_space<vmem>>, vector<8x32xf32>
    %cst_64 = arith.constant dense<0.000000e+00> : vector<16x32xf32>
    %104 = tpu.matmul %102, %103, %cst_64 {dimension_numbers = #tpu.dot_dimension_numbers<[1], [0], [0], [1], [0, 0, 1, 1], [], []>} : vector<16x8xf32>, vector<8x32xf32>, vector<16x32xf32> -> vector<16x32xf32>
    %105 = vector.broadcast %7 : vector<1x32xf32> to vector<16x32xf32>
    %106 = arith.addf %105, %104 : vector<16x32xf32>
    %c1_65 = arith.constant 1 : index
    %c0_66 = arith.constant 0 : index
    %107 = tpu.strided_load %arg7[%c1_65, %c0_66] {strides = array<i32: 4, 1>} : memref<64x8xf32, #tpu.memory_space<vmem>>, vector<16x8xf32>
    %c8_67 = arith.constant 8 : index
    %c0_68 = arith.constant 0 : index
    %108 = vector.load %arg4[%c8_67, %c0_68] : memref<32x32xf32, #tpu.memory_space<vmem>>, vector<8x32xf32>
    %cst_69 = arith.constant dense<0.000000e+00> : vector<16x32xf32>
    %109 = tpu.matmul %107, %108, %cst_69 {dimension_numbers = #tpu.dot_dimension_numbers<[1], [0], [0], [1], [0, 0, 1, 1], [], []>} : vector<16x8xf32>, vector<8x32xf32>, vector<16x32xf32> -> vector<16x32xf32>
    %110 = arith.addf %106, %109 : vector<16x32xf32>
    %c2_70 = arith.constant 2 : index
    %c0_71 = arith.constant 0 : index
    %111 = tpu.strided_load %arg7[%c2_70, %c0_71] {strides = array<i32: 4, 1>} : memref<64x8xf32, #tpu.memory_space<vmem>>, vector<16x8xf32>
    %c16_72 = arith.constant 16 : index
    %c0_73 = arith.constant 0 : index
    %112 = vector.load %arg4[%c16_72, %c0_73] : memref<32x32xf32, #tpu.memory_space<vmem>>, vector<8x32xf32>
    %cst_74 = arith.constant dense<0.000000e+00> : vector<16x32xf32>
    %113 = tpu.matmul %111, %112, %cst_74 {dimension_numbers = #tpu.dot_dimension_numbers<[1], [0], [0], [1], [0, 0, 1, 1], [], []>} : vector<16x8xf32>, vector<8x32xf32>, vector<16x32xf32> -> vector<16x32xf32>
    %114 = arith.addf %110, %113 : vector<16x32xf32>
    %c3_75 = arith.constant 3 : index
    %c0_76 = arith.constant 0 : index
    %115 = tpu.strided_load %arg7[%c3_75, %c0_76] {strides = array<i32: 4, 1>} : memref<64x8xf32, #tpu.memory_space<vmem>>, vector<16x8xf32>
    %c24_77 = arith.constant 24 : index
    %c0_78 = arith.constant 0 : index
    %116 = vector.load %arg4[%c24_77, %c0_78] : memref<32x32xf32, #tpu.memory_space<vmem>>, vector<8x32xf32>
    %cst_79 = arith.constant dense<0.000000e+00> : vector<16x32xf32>
    %117 = tpu.matmul %115, %116, %cst_79 {dimension_numbers = #tpu.dot_dimension_numbers<[1], [0], [0], [1], [0, 0, 1, 1], [], []>} : vector<16x8xf32>, vector<8x32xf32>, vector<16x32xf32> -> vector<16x32xf32>
    %118 = arith.addf %114, %117 : vector<16x32xf32>
    %119 = vector.extract_strided_slice %6 {offsets = [0, 24], sizes = [64, 8], strides = [1, 1]} : vector<64x96xf32> to vector<64x8xf32>
    %120 = vector.extract_strided_slice %6 {offsets = [0, 56], sizes = [64, 8], strides = [1, 1]} : vector<64x96xf32> to vector<64x8xf32>
    %121 = vector.extract_strided_slice %6 {offsets = [0, 88], sizes = [64, 8], strides = [1, 1]} : vector<64x96xf32> to vector<64x8xf32>
    %122 = vector.shape_cast %119 : vector<64x8xf32> to vector<8x8x8xf32>
    %123 = vector.shape_cast %120 : vector<64x8xf32> to vector<8x8x8xf32>
    %124 = vector.shape_cast %121 : vector<64x8xf32> to vector<8x8x8xf32>
    "tpu.trace_start"() <{level = 10 : i32, message = "nwd,nud->nwu"}> : () -> ()
    %cst_80 = arith.constant dense<0.000000e+00> : vector<8x8x8xf32>
    %125 = tpu.matmul %122, %123, %cst_80 {dimension_numbers = #tpu.dot_dimension_numbers<[2], [2], [1], [1], [0, 0, 0, 1, 1, 1], [0], [0]>} : vector<8x8x8xf32>, vector<8x8x8xf32>, vector<8x8x8xf32> -> vector<8x8x8xf32>
    "tpu.trace_stop"() : () -> ()
    %cst_81 = arith.constant dense<0xFF800000> : vector<8x8xf32>
    %126 = vector.multi_reduction <maximumf>, %125, %cst_81 [2] : vector<8x8x8xf32> to vector<8x8xf32>
    %127 = vector.shape_cast %126 : vector<8x8xf32> to vector<8x8x1xf32>
    %128 = vector.broadcast %127 : vector<8x8x1xf32> to vector<8x8x8xf32>
    %129 = arith.subf %125, %128 : vector<8x8x8xf32>
    %130 = math.exp %129 : vector<8x8x8xf32>
    %cst_82 = arith.constant dense<0.000000e+00> : vector<8x8xf32>
    %131 = vector.multi_reduction <add>, %130, %cst_82 [2] : vector<8x8x8xf32> to vector<8x8xf32>
    %132 = vector.shape_cast %131 : vector<8x8xf32> to vector<8x8x1xf32>
    %133 = tpu.reciprocal %132 {approx = true} : vector<8x8x1xf32> -> vector<8x8x1xf32>
    %134 = vector.broadcast %133 : vector<8x8x1xf32> to vector<8x8x8xf32>
    %135 = arith.mulf %130, %134 : vector<8x8x8xf32>
    "tpu.trace_start"() <{level = 10 : i32, message = "nwu,nud->nwd"}> : () -> ()
    %cst_83 = arith.constant dense<0.000000e+00> : vector<8x8x8xf32>
    %136 = tpu.matmul %135, %124, %cst_83 {dimension_numbers = #tpu.dot_dimension_numbers<[2], [1], [1], [2], [0, 0, 0, 1, 1, 2], [0], [0]>} : vector<8x8x8xf32>, vector<8x8x8xf32>, vector<8x8x8xf32> -> vector<8x8x8xf32>
    "tpu.trace_stop"() : () -> ()
    %137 = vector.shape_cast %136 : vector<8x8x8xf32> to vector<64x8xf32>
    %c0_84 = arith.constant 0 : index
    %c0_85 = arith.constant 0 : index
    %138 = vector.load %arg7[%c0_84, %c0_85] : memref<64x8xf32, #tpu.memory_space<vmem>>, vector<64x8xf32>
    tpu.vector_store %arg7[%c0_84, %c0_85], %137 {strides = array<i32>} : memref<64x8xf32, #tpu.memory_space<vmem>>, vector<64x8xf32>,
    %c0_86 = arith.constant 0 : index
    %c0_87 = arith.constant 0 : index
    %139 = tpu.strided_load %arg7[%c0_86, %c0_87] {strides = array<i32: 4, 1>} : memref<64x8xf32, #tpu.memory_space<vmem>>, vector<16x8xf32>
    %c0_88 = arith.constant 0 : index
    %c0_89 = arith.constant 0 : index
    %140 = vector.load %arg4[%c0_88, %c0_89] : memref<32x32xf32, #tpu.memory_space<vmem>>, vector<8x32xf32>
    %cst_90 = arith.constant dense<0.000000e+00> : vector<16x32xf32>
    %141 = tpu.matmul %139, %140, %cst_90 {dimension_numbers = #tpu.dot_dimension_numbers<[1], [0], [0], [1], [0, 0, 1, 1], [], []>} : vector<16x8xf32>, vector<8x32xf32>, vector<16x32xf32> -> vector<16x32xf32>
    %142 = vector.broadcast %7 : vector<1x32xf32> to vector<16x32xf32>
    %143 = arith.addf %142, %141 : vector<16x32xf32>
    %c1_91 = arith.constant 1 : index
    %c0_92 = arith.constant 0 : index
    %144 = tpu.strided_load %arg7[%c1_91, %c0_92] {strides = array<i32: 4, 1>} : memref<64x8xf32, #tpu.memory_space<vmem>>, vector<16x8xf32>
    %c8_93 = arith.constant 8 : index
    %c0_94 = arith.constant 0 : index
    %145 = vector.load %arg4[%c8_93, %c0_94] : memref<32x32xf32, #tpu.memory_space<vmem>>, vector<8x32xf32>
    %cst_95 = arith.constant dense<0.000000e+00> : vector<16x32xf32>
    %146 = tpu.matmul %144, %145, %cst_95 {dimension_numbers = #tpu.dot_dimension_numbers<[1], [0], [0], [1], [0, 0, 1, 1], [], []>} : vector<16x8xf32>, vector<8x32xf32>, vector<16x32xf32> -> vector<16x32xf32>
    %147 = arith.addf %143, %146 : vector<16x32xf32>
    %c2_96 = arith.constant 2 : index
    %c0_97 = arith.constant 0 : index
    %148 = tpu.strided_load %arg7[%c2_96, %c0_97] {strides = array<i32: 4, 1>} : memref<64x8xf32, #tpu.memory_space<vmem>>, vector<16x8xf32>
    %c16_98 = arith.constant 16 : index
    %c0_99 = arith.constant 0 : index
    %149 = vector.load %arg4[%c16_98, %c0_99] : memref<32x32xf32, #tpu.memory_space<vmem>>, vector<8x32xf32>
    %cst_100 = arith.constant dense<0.000000e+00> : vector<16x32xf32>
    %150 = tpu.matmul %148, %149, %cst_100 {dimension_numbers = #tpu.dot_dimension_numbers<[1], [0], [0], [1], [0, 0, 1, 1], [], []>} : vector<16x8xf32>, vector<8x32xf32>, vector<16x32xf32> -> vector<16x32xf32>
    %151 = arith.addf %147, %150 : vector<16x32xf32>
    %c3_101 = arith.constant 3 : index
    %c0_102 = arith.constant 0 : index
    %152 = tpu.strided_load %arg7[%c3_101, %c0_102] {strides = array<i32: 4, 1>} : memref<64x8xf32, #tpu.memory_space<vmem>>, vector<16x8xf32>
    %c24_103 = arith.constant 24 : index
    %c0_104 = arith.constant 0 : index
    %153 = vector.load %arg4[%c24_103, %c0_104] : memref<32x32xf32, #tpu.memory_space<vmem>>, vector<8x32xf32>
    %cst_105 = arith.constant dense<0.000000e+00> : vector<16x32xf32>
    %154 = tpu.matmul %152, %153, %cst_105 {dimension_numbers = #tpu.dot_dimension_numbers<[1], [0], [0], [1], [0, 0, 1, 1], [], []>} : vector<16x8xf32>, vector<8x32xf32>, vector<16x32xf32> -> vector<16x32xf32>
    %155 = arith.addf %151, %154 : vector<16x32xf32>
    %156 = tpu.concatenate %44, %81, %118, %155 in 0 : vector<16x32xf32>, vector<16x32xf32>, vector<16x32xf32>, vector<16x32xf32> -> vector<64x32xf32>
    %c0_106 = arith.constant 0 : index
    %c0_107 = arith.constant 0 : index
    %c0_108 = arith.constant 0 : index
    %157 = vector.load %arg6[%c0_106, %c0_107, %c0_108] : memref<1x64x32xf32, #tpu.memory_space<vmem>>, vector<1x64x32xf32>
    %158 = vector.shape_cast %157 : vector<1x64x32xf32> to vector<64x32xf32>
    %159 = vector.shape_cast %156 : vector<64x32xf32> to vector<1x64x32xf32>
    tpu.vector_store %arg6[%c0_106, %c0_107, %c0_108], %159 {strides = array<i32>} : memref<1x64x32xf32, #tpu.memory_space<vmem>>, vector<1x64x32xf32>,
    return
  }
  func.func @transform_0(%arg0: i32) -> (i32, i32, i32) {
    %c0_i32 = arith.constant 0 : i32
    %c0_i32_0 = arith.constant 0 : i32
    %c0_i32_1 = arith.constant 0 : i32
    return %arg0, %c0_i32, %c0_i32_0 : i32, i32, i32
  }
  func.func @transform_1(%arg0: i32) -> (i32, i32) {
    %c0_i32 = arith.constant 0 : i32
    %c0_i32_0 = arith.constant 0 : i32
    %c0_i32_1 = arith.constant 0 : i32
    return %c0_i32, %c0_i32_0 : i32, i32
  }
  func.func @transform_2(%arg0: i32) -> (i32, i32) {
    %c0_i32 = arith.constant 0 : i32
    %c0_i32_0 = arith.constant 0 : i32
    %c0_i32_1 = arith.constant 0 : i32
    return %c0_i32, %c0_i32_0 : i32, i32
  }
  func.func @transform_3(%arg0: i32) -> (i32, i32) {
    %c0_i32 = arith.constant 0 : i32
    %c0_i32_0 = arith.constant 0 : i32
    %c0_i32_1 = arith.constant 0 : i32
    return %c0_i32, %c0_i32_0 : i32, i32
  }
  func.func @transform_4(%arg0: i32) -> (i32, i32) {
    %c0_i32 = arith.constant 0 : i32
    %c0_i32_0 = arith.constant 0 : i32
    %c0_i32_1 = arith.constant 0 : i32
    return %c0_i32, %c0_i32_0 : i32, i32
  }
  func.func @transform_5(%arg0: i32) -> (i32, i32, i32) {
    %c0_i32 = arith.constant 0 : i32
    %c0_i32_0 = arith.constant 0 : i32
    %c0_i32_1 = arith.constant 0 : i32
    return %arg0, %c0_i32, %c0_i32_0 : i32, i32, i32
  }
}

</mosaic_0001>

<bundles_post_ra>
// kernel: tpu_custom_call.1
= control target key start
LH: loop header
LB: loop body
LE: loop exit
PB: predicated region body
PF: predicated region fallthrough
CT: control target
= control target key end

     0   :  { %s8092_s18 = smov 0   ;;  %s8919_s0 = inlined_call_operand.vmem [shape: f32[2,64,32], index: 0, kind: input, shape index: {}]   ;;  %s8920_s1 = inlined_call_operand.vmem [shape: f32[32,96], index: 1, kind: input, shape index: {}]   ;;  %s8921_s2 = inlined_call_operand.vmem [shape: f32[1,96], index: 2, kind: input, shape index: {}]   ;;  %s8922_s3 = inlined_call_operand.vmem [shape: f32[32,32], index: 3, kind: input, shape index: {}]   ;;  %s8923_s4 = inlined_call_operand.vmem [shape: f32[1,32], index: 4, kind: input, shape index: {}]   ;;  %s8924_s5 = inlined_call_operand.vmem [shape: f32[2,64,32], index: 5, kind: output, shape index: {}]  }
   0x1 LB: > { %s7132_s19 = sadd.s32 4294967295, %s8047_s18   ;;  %p7136_p0 = scmp.ge.s32.totalorder %s8047_s18, 1  ;;  %s8047_s18 = sphi %s8092_s18, %s15_s18  }
   0x2   : > { %p187_p1 = scmp.lt.s32.totalorder %s8047_s18, 3 }
   0x4   : > { %p188_p2 = pnand %p7136_p0, %p187_p1 }
   0x5   : > { %p215_p3 = scmp.lt.s32.totalorder (!%p188_p2), %s7132_s19, 1  ;;  %s8051_s9 = smov (!%p188_p2), 96  }
   0x6   : > { %191 = sbr.rel (%p188_p2) target bundleno = 3506 (0xdb2), region = 40  ;;  %s8052_s10 = smov (!%p188_p2), 64  }
   0x7   : > { %s8053_s11 = smov (!%p188_p2), 88   ;;  %s8054_s12 = smov (!%p188_p2), 120  }
   0x8   : > { %s8057_s29 = smov (!%p188_p2), 112   ;;  %s8058_s30 = smov (!%p188_p2), 48  }
   0x9   : > { %s8060_s7 = smov (!%p188_p2), 104   ;;  %s8061_s20 = smov (!%p188_p2), 40  }
   0xb   : > { %v236_v0 = vld [vmem:[%s8920_s1 + $0x18] sm:$0xff]  ;;  %v235_v1 = vld [vmem:[%s8920_s1 + $0x10] sm:$0xff]  ;;  %v234_v2 = vld [vmem:[%s8920_s1 + $0x8] sm:$0xff]  ;;  %s8926_s19 = smov (!%p215_p3, %s7132_s19), 1  ;;  %vm244_vm0 = vcmask 261120   ;;  %v8049_v12 = vmov 0.0  }
   0xc   : > { %7471 = vmatprep.subr.mxu0 %v236_v0  ;;  %v233_v3 = vld [vmem:[%s8920_s1] sm:$0xff]  ;;  %s7281_s28 = sshll.u32 %s8926_s19, 6  ;;  %7491 = vmatprep.subr.mxu1 %v8049_v12  ;;  %vm8050_vm1 = vmmov 0   ;;  %vm378_vm2 = vcmask 64512   ;;  %s8055_s19 = smov 56  }
   0xd   : > { %7472 = vmatpush3.msra.mxu0 %v236_v0  ;;  %s219_s6 = scalar_lea.vmem %s8919_s0, %s7281_s28  ;;  %7493 = vmatprep.mubr.msk.f32.mxu1 %vm8050_vm1, %v8049_v12  ;;  %v7141_v14 = vld [vmem:[%s8921_s2] ss:$0 sm:$0xff]  ;;  %s8425_s27 = scalar_lea.vmem %s8924_s5, %s7281_s28 }
   0xe   : > { %7473 = vmatprep.subr.mxu0 %v235_v1  ;;  %v225_v4 = vld [vmem:[%s219_s6] sm:$0xff]  ;;  %v226_v5 = vld [vmem:[%s219_s6 + $0x8] sm:$0xff]  ;;  %v227_v6 = vld [vmem:[%s219_s6 + $0x10] sm:$0xff]  ;;  %s8056_s28 = smov 80  }
   0xf   : > { %7474 = vmatpush3.msra.mxu0 %v235_v1  ;;  %7479 = vmatprep.mubr.msk.f32.mxu0 %vm244_vm0, %v225_v4  ;;  %v228_v7 = vld [vmem:[%s219_s6 + $0x18] sm:$0xff]  ;;  %v229_v8 = vld [vmem:[%s219_s6 + $0x20] sm:$0xff]  ;;  %v230_v9 = vld [vmem:[%s219_s6 + $0x28] sm:$0xff] }
  0x10   : > { %7475 = vmatprep.subr.mxu0 %v234_v2  ;;  %v231_v10 = vld [vmem:[%s219_s6 + $0x30] sm:$0xff]  ;;  %v232_v11 = vld [vmem:[%s219_s6 + $0x38] sm:$0xff]  ;;  %s8059_s6 = smov 72  }
  0x11   : > { %7476 = vmatpush3.msra.mxu0 %v234_v2 }
  0x12   : > { %7477 = vmatprep.subr.mxu0 %v233_v3 }
  0x13   : > { %7478 = vmatpush3.msra.mxu0 %v233_v3 }
  0x14   : > { %7480 = vmatmul.mubr.msk.f32.vlgmr.msra.gmra.mxu0 %vm244_vm0, %v226_v5  ;;  %7516 = vmatprep.subr.mxu0 %v8049_v12 }
  0x15   : > { %7482 = vmatprep.mubr.msk.f32.mxu0 %vm244_vm0, %v227_v6 }
  0x18   : > { %7483 = vmatmul.mubr.msk.f32.gmra.mxu0 %vm244_vm0, %v228_v7 }
  0x19   : > { %7485 = vmatprep.mubr.msk.f32.mxu0 %vm244_vm0, %v229_v8 }
  0x1c   : > { %7486 = vmatmul.mubr.msk.f32.gmra.mxu0 %vm244_vm0, %v230_v9 }
  0x1d   : > { %7488 = vmatprep.mubr.msk.f32.mxu0 %vm244_vm0, %v231_v10 }
  0x20   : > { %7489 = vmatmul.mubr.msk.f32.gmra.mxu0 %vm244_vm0, %v232_v11 }
  0x21   : > { %7518 = vmatprep.mubr.msk.f32.mxu0 %vm8050_vm1, %v8049_v12 }
  0xd4   : > { %v7481_v13 = vpop.f32.mrf.mxu0 }
  0xd5   : > { %v8140_v19 = vadd.f32 %v7481_v13, %v7141_v14 }
  0xd6   : > { %v335_v15 = vpop.f32.mrf.mxu0 }
  0xd7   : > { %v8137_v16 = vadd.f32 %v7141_v14, %v335_v15 }
  0xd8   : > { %v7484_v17 = vpop.f32.mrf.mxu0 }
  0xd9   : > { %376 = vrot.lane.b32.xlu0 %v8137_v16, %s8051_s9  ;;  %v8146_v23 = vadd.f32 %v7484_v17, %v7141_v14 }
  0xda   : > { %v345_v18 = vpop.f32.mrf.mxu0 }
  0xdb   : > { %v8142_v20 = vadd.f32 %v7141_v14, %v345_v18 }
  0xdc   : > { %v7487_v21 = vpop.f32.mrf.mxu0 }
  0xdd   : > { %531 = vrot.lane.b32.xlu1 %v8142_v20, %s8051_s9  ;;  %454 = vrot.lane.b32.xlu0 %v8140_v19, %s8051_s9  ;;  %v8151_v26 = vadd.f32 %v7487_v21, %v7141_v14 }
  0xde   : > { %v355_v22 = vpop.f32.mrf.mxu0 }
  0xdf   : > { %v8148_v24 = vadd.f32 %v7141_v14, %v355_v22 }
  0xe0   : > { %v7490_v25 = vpop.f32.mrf.mxu0 }
  0xe1   : > { %608 = vrot.lane.b32.xlu1 %v8146_v23, %s8051_s9  ;;  %685 = vrot.lane.b32.xlu0 %v8148_v24, %s8051_s9  ;;  %v8157_v29 = vadd.f32 %v7490_v25, %v7141_v14 }
  0xe2   : > { %v365_v27 = vpop.f32.mrf.mxu0 }
  0xe3   : > { %v8154_v28 = vadd.f32 %v7141_v14, %v365_v27 }
  0xe5   : > { %762 = vrot.lane.b32.xlu1 %v8151_v26, %s8051_s9  ;;  %839 = vrot.lane.b32.xlu0 %v8154_v28, %s8051_s9 }
  0xe9   : > { %916 = vrot.lane.b32.xlu1 %v8157_v29, %s8051_s9 }
 0x14b   : > { %v377_v30 = vpop.permute.xlu0 %376 }
 0x14c   : > { %7492 = vmatpush3.xpose.msk.msra.mxu1 %vm378_vm2, %v377_v30 }
 0x14d   : > { %7496 = vmatprep.subr.mxu1 %v8049_v12 }
 0x14f   : > { %v532_v31 = vpop.permute.xlu1 %531  ;;  %7494 = vmatmul.mubr.msk.f32.vlgmr.msra.gmra.mxu1 %vm378_vm2, %v8137_v16  ;;  %v455_v32 = vpop.permute.xlu0 %454 }
 0x150   : > { %7497 = vmatpush3.xpose.msk.msra.mxu1 %vm378_vm2, %v455_v32  ;;  %7498 = vmatprep.mubr.msk.f32.mxu1 %vm8050_vm1, %v8049_v12 }
 0x151   : > { %7501 = vmatprep.subr.mxu1 %v8049_v12 }
 0x153   : > { %v609_v33 = vpop.permute.xlu1 %608  ;;  %7499 = vmatmul.mubr.msk.f32.vlgmr.msra.gmra.mxu1 %vm378_vm2, %v8140_v19  ;;  %v686_v35 = vpop.permute.xlu0 %685 }
 0x154   : > { %7502 = vmatpush3.xpose.msk.msra.mxu1 %vm378_vm2, %v532_v31  ;;  %7503 = vmatprep.mubr.msk.f32.mxu1 %vm8050_vm1, %v8049_v12 }
 0x155   : > { %7506 = vmatprep.subr.mxu1 %v8049_v12 }
 0x157   : > { %v763_v34 = vpop.permute.xlu1 %762  ;;  %7504 = vmatmul.mubr.msk.f32.vlgmr.msra.gmra.mxu1 %vm378_vm2, %v8142_v20  ;;  %v840_v37 = vpop.permute.xlu0 %839 }
 0x158   : > { %7507 = vmatpush3.xpose.msk.msra.mxu1 %vm378_vm2, %v609_v33  ;;  %7517 = vmatpush3.xpose.msk.msra.mxu0 %vm378_vm2, %v763_v34 }
 0x159   : > { %7508 = vmatprep.mubr.msk.f32.mxu1 %vm8050_vm1, %v8049_v12  ;;  %7526 = vmatprep.subr.mxu0 %v8049_v12 }
 0x15a   : > { %7511 = vmatprep.subr.mxu1 %v8049_v12 }
 0x15b   : > { %7519 = vmatmul.mubr.msk.f32.vlgmr.msra.gmra.mxu0 %vm378_vm2, %v8151_v26  ;;  %v917_v36 = vpop.permute.xlu1 %916  ;;  %7509 = vmatmul.mubr.msk.f32.vlgmr.msra.gmra.mxu1 %vm378_vm2, %v8146_v23 }
 0x15c   : > { %7512 = vmatpush3.xpose.msk.msra.mxu1 %vm378_vm2, %v686_v35  ;;  %7527 = vmatpush3.xpose.msk.msra.mxu0 %vm378_vm2, %v917_v36 }
 0x15d   : > { %7513 = vmatprep.mubr.msk.f32.mxu1 %vm8050_vm1, %v8049_v12  ;;  %7528 = vmatprep.mubr.msk.f32.mxu0 %vm8050_vm1, %v8049_v12 }
 0x15e   : > { %7521 = vmatprep.subr.mxu1 %v8049_v12  ;;  %7536 = vmatprep.subr.mxu0 %v8049_v12 }
 0x15f   : > { %7514 = vmatmul.mubr.msk.f32.vlgmr.msra.gmra.mxu1 %vm378_vm2, %v8148_v24  ;;  %7529 = vmatmul.mubr.msk.f32.vlgmr.msra.gmra.mxu0 %vm378_vm2, %v8157_v29 }
 0x160   : > { %7522 = vmatpush3.xpose.msk.msra.mxu1 %vm378_vm2, %v840_v37  ;;  %7523 = vmatprep.mubr.msk.f32.mxu1 %vm8050_vm1, %v8049_v12 }
 0x161   : > { %7531 = vmatprep.subr.mxu1 %v8049_v12  ;;  %7538 = vmatprep.mubr.msk.f32.mxu0 %vm8050_vm1, %v8049_v12 }
 0x163   : > { %7524 = vmatmul.mubr.msk.f32.vlgmr.msra.gmra.mxu1 %vm378_vm2, %v8154_v28 }
 0x164   : > { %7533 = vmatprep.mubr.msk.f32.mxu1 %vm8050_vm1, %v8049_v12 }
 0x20f   : > { %v449_v38 = vpop.f32.mrf.mxu1 }
 0x210   : > { %v992_v39 = vsel %vm378_vm2, %v449_v38, -inf }
 0x211   : > { %993 = vmax.xlane.f32.xlu0 %v992_v39  ;;  %v7495_v40 = vpop.f32.mrf.mxu1 }
 0x213   : > { %v526_v41 = vpop.f32.mrf.mxu1 }
 0x214   : > { %v995_v42 = vsel %vm378_vm2, %v526_v41, -inf }
 0x215   : > { %996 = vmax.xlane.f32.xlu1 %v995_v42  ;;  %v7500_v43 = vpop.f32.mrf.mxu1 }
 0x217   : > { %v603_v44 = vpop.f32.mrf.mxu1 }
 0x218   : > { %v998_v45 = vsel %vm378_vm2, %v603_v44, -inf }
 0x219   : > { %999 = vmax.xlane.f32.xlu0 %v998_v45  ;;  %v7505_v46 = vpop.f32.mrf.mxu1 }
 0x21b   : > { %v680_v47 = vpop.f32.mrf.mxu1  ;;  %v834_v48 = vpop.f32.mrf.mxu0 }
 0x21c   : > { %v1001_v49 = vsel %vm378_vm2, %v680_v47, -inf  ;;  %v1007_v54 = vsel %vm378_vm2, %v834_v48, -inf }
 0x21d   : > { %v7520_v50 = vpop.f32.mrf.mxu0  ;;  %1002 = vmax.xlane.f32.xlu0 %v1001_v49  ;;  %v7510_v51 = vpop.f32.mrf.mxu1 }
 0x21f   : > { %v8213_v52 = vpop.f32.mrf.mxu1  ;;  %v988_v53 = vpop.f32.mrf.mxu0 }
 0x220   : > { %v1013_v58 = vsel %vm378_vm2, %v988_v53, -inf  ;;  %v1004_v60 = vsel %vm378_vm2, %v8213_v52, -inf }
 0x221   : > { %v7530_v55 = vpop.f32.mrf.mxu0  ;;  %1008 = vmax.xlane.f32.xlu0 %v1007_v54  ;;  %v7515_v56 = vpop.f32.mrf.mxu1 }
 0x223   : > { %v8216_v57 = vpop.f32.mrf.mxu1 }
 0x224   : > { %v1010_v61 = vsel %vm378_vm2, %v8216_v57, -inf }
 0x225   : > { %1014 = vmax.xlane.f32.xlu0 %v1013_v58  ;;  %v7525_v59 = vpop.f32.mrf.mxu1 }
 0x226   : > { %1080 = vrot.lane.b32.xlu1 %v8137_v16, %s8052_s10 }
 0x22a   : > { %1232 = vrot.lane.b32.xlu1 %v8142_v20, %s8052_s10 }
 0x23b   : > { %1156 = vrot.lane.b32.xlu0 %v8140_v19, %s8052_s10 }
 0x24e   : > { %1005 = vmax.xlane.f32.xlu1 %v1004_v60 }
 0x252   : > { %1011 = vmax.xlane.f32.xlu1 %v1010_v61 }
 0x263   : > { %1308 = vrot.lane.b32.xlu1 %v8146_v23, %s8052_s10 }
 0x29a   : > { %v994_v62 = vpop.xlane.xlu0 %993 }
 0x29b   : > { %v1016_v63 = vsub.f32 %v449_v38, %v994_v62 }
 0x29d   : > { %v1024_v0 = vmul.f32 1.442695, %v1016_v63 }
 0x29e   : > { %v997_v1 = vpop.xlane.xlu1 %996 }
 0x29f   : > { %7912 = vpow2.f32 %v1024_v0  ;;  %v1017_v2 = vsub.f32 %v526_v41, %v997_v1 }
 0x2a1   : > { %v1026_v3 = vmul.f32 1.442695, %v1017_v2 }
 0x2a2   : > { %v1081_v4 = vpop.permute.xlu1 %1080  ;;  %v1000_v5 = vpop.xlane.xlu0 %999 }
 0x2a3   : > { %7914 = vpow2.f32 %v1026_v3  ;;  %v1018_v6 = vsub.f32 %v603_v44, %v1000_v5  ;;  %7532 = vmatpush3.msra.mxu1 %v1081_v4 }
 0x2a4   : > { %7541 = vmatprep.subr.mxu1 %v8049_v12 }
 0x2a5   : > { %v1028_v7 = vmul.f32 1.442695, %v1018_v6 }
 0x2a6   : > { %v1003_v8 = vpop.xlane.xlu0 %1002  ;;  %v1233_v39 = vpop.permute.xlu1 %1232 }
 0x2a7   : > { %7916 = vpow2.f32 %v1028_v7  ;;  %v1019_v13 = vsub.f32 %v680_v47, %v1003_v8 }
 0x2a9   : > { %v1030_v22 = vmul.f32 1.442695, %v1019_v13 }
 0x2aa   : > { %v1009_v9 = vpop.xlane.xlu0 %1008 }
 0x2ab   : > { %v1021_v10 = vsub.f32 %v834_v48, %v1009_v9 }
 0x2ac   : > { %v8232_v11 = vpop.eup %7912 }
 0x2ad   : > { %v1034_v14 = vmul.f32 1.442695, %v1021_v10  ;;  %v1040_v15 = vsel %vm378_vm2, %v8232_v11, 0.0 }
 0x2ae   : > { %1041 = vadd.xlane.f32.xlu1 %v1040_v15  ;;  %v1015_v17 = vpop.xlane.xlu0 %1014 }
 0x2af   : > { %7918 = vpow2.f32 %v1034_v14  ;;  %v1023_v18 = vsub.f32 %v988_v53, %v1015_v17  ;;  %v8326_v17 = vld [vmem:[%s8922_s3] sm:$0xff] }
 0x2b0   : > { %v8236_v21 = vpop.eup %7914 }
 0x2b1   : > { %v1038_v25 = vmul.f32 1.442695, %v1023_v18  ;;  %v1043_v27 = vsel %vm378_vm2, %v8236_v21, 0.0  ;;  %v8331_v18 = vld [vmem:[%s8922_s3 + $0x8] sm:$0xff] }
 0x2b2   : > { %1044 = vadd.xlane.f32.xlu0 %v1043_v27  ;;  %v1157_v30 = vpop.permute.xlu0 %1156 }
 0x2b3   : > { %7920 = vpow2.f32 %v1038_v25  ;;  %7537 = vmatpush3.msra.mxu0 %v1157_v30 }
 0x2b4   : > { %v8240_v31 = vpop.eup %7916  ;;  %7546 = vmatprep.subr.mxu0 %v8049_v12  ;;  %7922 = vpow2.f32 %v1030_v22  ;;  %v8346_v22 = vld [vmem:[%s8922_s3 + $0x18] sm:$0xff] }
 0x2b5   : > { %v1046_v32 = vsel %vm378_vm2, %v8240_v31, 0.0 }
 0x2b6   : > { %1047 = vadd.xlane.f32.xlu1 %v1046_v32 }
 0x2bc   : > { %v8245_v33 = vpop.eup %7918 }
 0x2bd   : > { %v1055_v34 = vsel %vm378_vm2, %v8245_v33, 0.0 }
 0x2be   : > { %1056 = vadd.xlane.f32.xlu0 %v1055_v34 }
 0x2c0   : > { %v8249_v35 = vpop.eup %7920 }
 0x2c1   : > { %v1061_v36 = vsel %vm378_vm2, %v8249_v35, 0.0  ;;  %v8253_v37 = vpop.eup %7922 }
 0x2c2   : > { %1062 = vadd.xlane.f32.xlu0 %v1061_v36  ;;  %v1049_v38 = vsel %vm378_vm2, %v8253_v37, 0.0 }
 0x2c6   : > { %1050 = vadd.xlane.f32.xlu0 %v1049_v38 }
 0x2c7   : > { %1460 = vrot.lane.b32.xlu1 %v8151_v26, %s8052_s10 }
 0x2d7   : > { %v1006_v40 = vpop.xlane.xlu1 %1005 }
 0x2d8   : > { %v1020_v41 = vsub.f32 %v8213_v52, %v1006_v40 }
 0x2da   : > { %v1032_v42 = vmul.f32 1.442695, %v1020_v41 }
 0x2db   : > { %v1012_v43 = vpop.xlane.xlu1 %1011 }
 0x2dc   : > { %7924 = vpow2.f32 %v1032_v42  ;;  %v1022_v44 = vsub.f32 %v8216_v57, %v1012_v43  ;;  %1384 = vrot.lane.b32.xlu0 %v8148_v24, %s8052_s10 }
 0x2de   : > { %v1036_v45 = vmul.f32 1.442695, %v1022_v44 }
 0x2df   : > { %v1309_v50 = vpop.permute.xlu1 %1308 }
 0x2e0   : > { %7926 = vpow2.f32 %v1036_v45  ;;  %1536 = vrot.lane.b32.xlu0 %v8154_v28, %s8052_s10 }
 0x2e4   : > { %2055 = vrot.lane.b32.xlu0 %v8137_v16, %s8053_s11 }
 0x2e8   : > { %2053 = vrot.lane.b32.xlu0 %v8137_v16, %s8054_s12 }
 0x2e9   : > { %v8267_v46 = vpop.eup %7924 }
 0x2ea   : > { %v1052_v47 = vsel %vm378_vm2, %v8267_v46, 0.0 }
 0x2eb   : > { %1053 = vadd.xlane.f32.xlu1 %v1052_v47 }
 0x2ec   : > { %2211 = vrot.lane.b32.xlu0 %v8142_v20, %s8053_s11 }
 0x2ed   : > { %v8272_v48 = vpop.eup %7926 }
 0x2ee   : > { %v1058_v49 = vsel %vm378_vm2, %v8272_v48, 0.0 }
 0x2ef   : > { %1059 = vadd.xlane.f32.xlu1 %v1058_v49 }
 0x2f0   : > { %2209 = vrot.lane.b32.xlu0 %v8142_v20, %s8054_s12 }
 0x2f4   : > { %2367 = vrot.lane.b32.xlu0 %v8148_v24, %s8053_s11 }
 0x2f8   : > { %2365 = vrot.lane.b32.xlu0 %v8148_v24, %s8054_s12 }
 0x2fc   : > { %2523 = vrot.lane.b32.xlu0 %v8154_v28, %s8053_s11 }
 0x300   : > { %1612 = vrot.lane.b32.xlu1 %v8157_v29, %s8052_s10  ;;  %2521 = vrot.lane.b32.xlu0 %v8154_v28, %s8054_s12 }
 0x304   : > { %2133 = vrot.lane.b32.xlu1 %v8140_v19, %s8053_s11 }
 0x308   : > { %2131 = vrot.lane.b32.xlu1 %v8140_v19, %s8054_s12 }
 0x30c   : > { %2289 = vrot.lane.b32.xlu1 %v8146_v23, %s8053_s11 }
 0x310   : > { %2287 = vrot.lane.b32.xlu1 %v8146_v23, %s8054_s12 }
 0x314   : > { %2445 = vrot.lane.b32.xlu1 %v8151_v26, %s8053_s11 }
 0x318   : > { %2443 = vrot.lane.b32.xlu1 %v8151_v26, %s8054_s12 }
 0x31c   : > { %2601 = vrot.lane.b32.xlu1 %v8157_v29, %s8053_s11 }
 0x320   : > { %2599 = vrot.lane.b32.xlu1 %v8157_v29, %s8054_s12 }
 0x337   : > { %v1042_v51 = vpop.xlane.xlu1 %1041 }
 0x338   : > { %7928 = vrcp.f32 %v1042_v51 }
 0x33b   : > { %v1045_v52 = vpop.xlane.xlu0 %1044 }
 0x33c   : > { %7930 = vrcp.f32 %v1045_v52 }
 0x33f   : > { %v1048_v53 = vpop.xlane.xlu1 %1047 }
 0x340   : > { %7932 = vrcp.f32 %v1048_v53 }
 0x343   : > { %v1461_v3 = vpop.permute.xlu1 %1460 }
 0x345   : > { %v7929_v54 = vpop.eup %7928 }
 0x346   : > { %v1072_v55 = vmul.f32 %v7929_v54, %v8232_v11 }
 0x347   : > { %v1057_v56 = vpop.xlane.xlu0 %1056 }
 0x348   : > { %7534 = vmatmul.mubr.msk.f32.vlgmr.msra.gmra.mxu1 %vm378_vm2, %v1072_v55 }
 0x349   : > { %v7931_v57 = vpop.eup %7930  ;;  %7542 = vmatpush3.msra.mxu1 %v1233_v39  ;;  %7543 = vmatprep.mubr.msk.f32.mxu1 %vm8050_vm1, %v8049_v12 }
 0x34a   : > { %v1073_v58 = vmul.f32 %v7931_v57, %v8236_v21  ;;  %7551 = vmatprep.subr.mxu1 %v8049_v12  ;;  %v8340_v21 = vld [vmem:[%s8922_s3 + $0x10] sm:$0xff] }
 0x34b   : > { %v1063_v59 = vpop.xlane.xlu0 %1062 }
 0x34c   : > { %7539 = vmatmul.mubr.msk.f32.vlgmr.msra.gmra.mxu0 %vm378_vm2, %v1073_v58 }
 0x34d   : > { %v7933_v60 = vpop.eup %7932  ;;  %7547 = vmatpush3.msra.mxu0 %v1309_v50  ;;  %7548 = vmatprep.mubr.msk.f32.mxu0 %vm8050_vm1, %v8049_v12 }
 0x34e   : > { %v1074_v61 = vmul.f32 %v7933_v60, %v8240_v31  ;;  %7556 = vmatprep.subr.mxu0 %v8049_v12 }
 0x34f   : > { %v1051_v62 = vpop.xlane.xlu0 %1050 }
 0x350   : > { %7934 = vrcp.f32 %v1051_v62  ;;  %7544 = vmatmul.mubr.msk.f32.vlgmr.msra.gmra.mxu1 %vm378_vm2, %v1074_v61 }
 0x351   : > { %7553 = vmatprep.mubr.msk.f32.mxu1 %vm8050_vm1, %v8049_v12  ;;  %7936 = vrcp.f32 %v1057_v56 }
 0x352   : > { %7938 = vrcp.f32 %v1063_v59 }
 0x353   : > { %v1385_v63 = vpop.permute.xlu0 %1384 }
 0x354   : > { %7552 = vmatpush3.msra.mxu1 %v1385_v63 }
 0x355   : > { %7561 = vmatprep.subr.mxu1 %v8049_v12 }
 0x357   : > { %v1537_v13 = vpop.permute.xlu0 %1536 }
 0x35b   : > { %v2056_v40 = vpop.permute.xlu0 %2055 }
 0x35d   : > { %v7935_v0 = vpop.eup %7934 }
 0x35e   : > { %v1075_v1 = vmul.f32 %v7935_v0, %v8253_v37  ;;  %v7937_v2 = vpop.eup %7936 }
 0x35f   : > { %v1077_v4 = vmul.f32 %v7937_v2, %v8245_v33  ;;  %v7939_v7 = vpop.eup %7938  ;;  %v2054_v43 = vpop.permute.xlu0 %2053 }
 0x360   : > { %7549 = vmatmul.mubr.msk.f32.vlgmr.msra.gmra.mxu0 %vm378_vm2, %v1075_v1  ;;  %v1079_v9 = vmul.f32 %v7939_v7, %v8249_v35 }
 0x361   : > { %7557 = vmatpush3.msra.mxu0 %v1461_v3  ;;  %7558 = vmatprep.mubr.msk.f32.mxu0 %vm8050_vm1, %v8049_v12 }
 0x362   : > { %7566 = vmatprep.subr.mxu0 %v8049_v12 }
 0x363   : > { %v2212_v47 = vpop.permute.xlu0 %2211 }
 0x364   : > { %7559 = vmatmul.mubr.msk.f32.vlgmr.msra.gmra.mxu0 %vm378_vm2, %v1077_v4  ;;  %v8416_v4 = vld [vmem:[%s8923_s4] ss:$0 sm:$0xff] }
 0x365   : > { %7568 = vmatprep.mubr.msk.f32.mxu0 %vm8050_vm1, %v8049_v12 }
 0x367   : > { %v2210_v52 = vpop.permute.xlu0 %2209 }
 0x36b   : > { %v2368_v57 = vpop.permute.xlu0 %2367 }
 0x36f   : > { %v2366_v62 = vpop.permute.xlu0 %2365 }
 0x373   : > { %v2524_v0 = vpop.permute.xlu0 %2523 }
 0x374   : > { %v1054_v5 = vpop.xlane.xlu1 %1053 }
 0x375   : > { %7940 = vrcp.f32 %v1054_v5 }
 0x377   : > { %v2522_v2 = vpop.permute.xlu0 %2521 }
 0x378   : > { %v1060_v6 = vpop.xlane.xlu1 %1059 }
 0x379   : > { %7942 = vrcp.f32 %v1060_v6 }
 0x37c   : > { %v1613_v8 = vpop.permute.xlu1 %1612 }
 0x37d   : > { %7567 = vmatpush3.msra.mxu0 %v1613_v8 }
 0x37e   : > { %7569 = vmatmul.mubr.msk.f32.vlgmr.msra.gmra.mxu0 %vm378_vm2, %v1079_v9  ;;  %7576 = vmatprep.subr.mxu0 %v8331_v18 }
 0x37f   : > { %7577 = vmatpush3.msra.mxu0 %v8331_v18 }
 0x380   : > { %7586 = vmatprep.subr.mxu0 %v8346_v22  ;;  %v2134_v41 = vpop.permute.xlu1 %2133 }
 0x382   : > { %v7941_v10 = vpop.eup %7940 }
 0x383   : > { %v1076_v11 = vmul.f32 %v7941_v10, %v8267_v46 }
 0x384   : > { %v2132_v45 = vpop.permute.xlu1 %2131 }
 0x385   : > { %7554 = vmatmul.mubr.msk.f32.vlgmr.msra.gmra.mxu1 %vm378_vm2, %v1076_v11 }
 0x386   : > { %v7943_v14 = vpop.eup %7942  ;;  %7562 = vmatpush3.msra.mxu1 %v1537_v13  ;;  %7563 = vmatprep.mubr.msk.f32.mxu1 %vm8050_vm1, %v8049_v12 }
 0x387   : > { %v1078_v15 = vmul.f32 %v7943_v14, %v8272_v48  ;;  %7571 = vmatprep.subr.mxu1 %v8326_v17 }
 0x388   : > { %v2290_v48 = vpop.permute.xlu1 %2289 }
 0x389   : > { %7564 = vmatmul.mubr.msk.f32.vlgmr.msra.gmra.mxu1 %vm378_vm2, %v1078_v15 }
 0x38a   : > { %7572 = vmatpush3.msra.mxu1 %v8326_v17 }
 0x38b   : > { %7581 = vmatprep.subr.mxu1 %v8340_v21 }
 0x38c   : > { %v2288_v53 = vpop.permute.xlu1 %2287 }
 0x390   : > { %v2446_v58 = vpop.permute.xlu1 %2445 }
 0x394   : > { %v2444_v63 = vpop.permute.xlu1 %2443 }
 0x398   : > { %v2602_v1 = vpop.permute.xlu1 %2601 }
 0x39c   : > { %v2600_v3 = vpop.permute.xlu1 %2599 }
 0x408   : > { %v1152_v25 = vpop.f32.mrf.mxu1 }
 0x409   : > { %1688 = vst.msk [vmem:[#allocation2] sm:$0xff] %vm378_vm2, %v1152_v25 }
 0x40a   : > { %v7535_v27 = vpop.f32.mrf.mxu1 }
 0x40c   : > { %v1228_v30 = vpop.f32.mrf.mxu0 }
 0x40d   : > { %1689 = vst.msk [vmem:[#allocation2 + $0x8] sm:$0xff] %vm378_vm2, %v1228_v30 }
 0x40e   : > { %v7540_v31 = vpop.f32.mrf.mxu0 }
 0x410   : > { %v1304_v32 = vpop.f32.mrf.mxu1 }
 0x411   : > { %1690 = vst.msk [vmem:[#allocation2 + $0x10] sm:$0xff] %vm378_vm2, %v1304_v32 }
 0x412   : > { %v7545_v33 = vpop.f32.mrf.mxu1 }
 0x420   : > { %v1380_v34 = vpop.f32.mrf.mxu0 }
 0x421   : > { %1691 = vst.msk [vmem:[#allocation2 + $0x18] sm:$0xff] %vm378_vm2, %v1380_v34 }
 0x422   : > { %v7550_v35 = vpop.f32.mrf.mxu0 }
 0x424   : > { %v1532_v36 = vpop.f32.mrf.mxu0 }
 0x425   : > { %1693 = vst.msk [vmem:[#allocation2 + $0x28] sm:$0xff] %vm378_vm2, %v1532_v36 }
 0x426   : > { %v7560_v37 = vpop.f32.mrf.mxu0 }
 0x428   : > { %v1696_v38 = vld [vmem:[#allocation2] ss:$4 sm:$0xff]  ;;  %v1790_v39 = vld [vmem:[#allocation2 + $0x1] ss:$4 sm:$0xff]  ;;  %v1878_v56 = vld [vmem:[#allocation2 + $0x2] ss:$4 sm:$0xff] }
 0x429   : > { %7573 = vmatprep.mubr.msk.f32.mxu1 %vm378_vm2, %v1696_v38  ;;  %7578 = vmatprep.mubr.msk.f32.mxu0 %vm378_vm2, %v1790_v39  ;;  %v1966_v59 = vld [vmem:[#allocation2 + $0x3] ss:$4 sm:$0xff] }
 0x43e   : > { %v1684_v42 = vpop.f32.mrf.mxu0 }
 0x43f   : > { %1695 = vst.msk [vmem:[#allocation2 + $0x38] sm:$0xff] %vm378_vm2, %v1684_v42 }
 0x440   : > { %v7570_v44 = vpop.f32.mrf.mxu0 }
 0x445   : > { %v1456_v46 = vpop.f32.mrf.mxu1 }
 0x446   : > { %1692 = vst.msk [vmem:[#allocation2 + $0x20] sm:$0xff] %vm378_vm2, %v1456_v46 }
 0x447   : > { %v7555_v49 = vpop.f32.mrf.mxu1 }
 0x449   : > { %v1608_v50 = vpop.f32.mrf.mxu1 }
 0x44a   : > { %1694 = vst.msk [vmem:[#allocation2 + $0x30] sm:$0xff] %vm378_vm2, %v1608_v50 }
 0x44b   : > { %v7565_v51 = vpop.f32.mrf.mxu1 }
 0x451   : > { %v1698_v54 = vld [vmem:[#allocation2 + $0x20] ss:$4 sm:$0xff]  ;;  %v1792_v55 = vld [vmem:[#allocation2 + $0x21] ss:$4 sm:$0xff]  ;;  %v1880_v60 = vld [vmem:[#allocation2 + $0x22] ss:$4 sm:$0xff] }
 0x452   : > { %7574 = vmatmul.mubr.msk.f32.vlgmr.msra.gmra.mxu1 %vm378_vm2, %v1698_v54  ;;  %7579 = vmatmul.mubr.msk.f32.vlgmr.msra.gmra.mxu0 %vm378_vm2, %v1792_v55  ;;  %v1968_v61 = vld [vmem:[#allocation2 + $0x23] ss:$4 sm:$0xff] }
 0x453   : > { %7582 = vmatpush3.msra.mxu1 %v8340_v21  ;;  %7583 = vmatprep.mubr.msk.f32.mxu1 %vm378_vm2, %v1878_v56 }
 0x454   : > { %7588 = vmatprep.mubr.msk.f32.mxu0 %vm378_vm2, %v1966_v59  ;;  %7587 = vmatpush3.msra.mxu0 %v8346_v22 }
 0x455   : > { %7591 = vmatprep.subr.mxu1 %v8049_v12  ;;  %7596 = vmatprep.subr.mxu0 %v8049_v12 }
 0x456   : > { %7584 = vmatmul.mubr.msk.f32.vlgmr.msra.gmra.mxu1 %vm378_vm2, %v1880_v60  ;;  %7589 = vmatmul.mubr.msk.f32.vlgmr.msra.gmra.mxu0 %vm378_vm2, %v1968_v61 }
 0x457   : > { %7592 = vmatpush3.xpose.msk.msra.mxu1 %vm378_vm2, %v2056_v40  ;;  %7597 = vmatpush3.xpose.msk.msra.mxu0 %vm378_vm2, %v2134_v41 }
 0x458   : > { %7593 = vmatprep.mubr.msk.f32.mxu1 %vm8050_vm1, %v8049_v12  ;;  %7598 = vmatprep.mubr.msk.f32.mxu0 %vm8050_vm1, %v8049_v12 }
 0x459   : > { %7601 = vmatprep.subr.mxu1 %v8049_v12  ;;  %7606 = vmatprep.subr.mxu0 %v8049_v12 }
 0x45a   : > { %7594 = vmatmul.mubr.msk.f32.vlgmr.msra.gmra.mxu1 %vm378_vm2, %v2054_v43  ;;  %7599 = vmatmul.mubr.msk.f32.vlgmr.msra.gmra.mxu0 %vm378_vm2, %v2132_v45 }
 0x45b   : > { %7602 = vmatpush3.xpose.msk.msra.mxu1 %vm378_vm2, %v2212_v47  ;;  %7607 = vmatpush3.xpose.msk.msra.mxu0 %vm378_vm2, %v2290_v48 }
 0x45c   : > { %7603 = vmatprep.mubr.msk.f32.mxu1 %vm8050_vm1, %v8049_v12  ;;  %7608 = vmatprep.mubr.msk.f32.mxu0 %vm8050_vm1, %v8049_v12 }
 0x45d   : > { %7611 = vmatprep.subr.mxu1 %v8049_v12  ;;  %7616 = vmatprep.subr.mxu0 %v8049_v12 }
 0x45e   : > { %7604 = vmatmul.mubr.msk.f32.vlgmr.msra.gmra.mxu1 %vm378_vm2, %v2210_v52  ;;  %7609 = vmatmul.mubr.msk.f32.vlgmr.msra.gmra.mxu0 %vm378_vm2, %v2288_v53 }
 0x45f   : > { %7612 = vmatpush3.xpose.msk.msra.mxu1 %vm378_vm2, %v2368_v57  ;;  %7617 = vmatpush3.xpose.msk.msra.mxu0 %vm378_vm2, %v2446_v58 }
 0x460   : > { %7613 = vmatprep.mubr.msk.f32.mxu1 %vm8050_vm1, %v8049_v12  ;;  %7618 = vmatprep.mubr.msk.f32.mxu0 %vm8050_vm1, %v8049_v12 }
 0x461   : > { %7621 = vmatprep.subr.mxu1 %v8049_v12  ;;  %7626 = vmatprep.subr.mxu0 %v8049_v12 }
 0x462   : > { %7614 = vmatmul.mubr.msk.f32.vlgmr.msra.gmra.mxu1 %vm378_vm2, %v2366_v62  ;;  %7619 = vmatmul.mubr.msk.f32.vlgmr.msra.gmra.mxu0 %vm378_vm2, %v2444_v63 }
 0x463   : > { %7622 = vmatpush3.xpose.msk.msra.mxu1 %vm378_vm2, %v2524_v0  ;;  %7627 = vmatpush3.xpose.msk.msra.mxu0 %vm378_vm2, %v2602_v1 }
 0x464   : > { %7623 = vmatprep.mubr.msk.f32.mxu1 %vm8050_vm1, %v8049_v12  ;;  %7628 = vmatprep.mubr.msk.f32.mxu0 %vm8050_vm1, %v8049_v12 }
 0x465   : > { %7631 = vmatprep.subr.mxu1 %v8049_v12  ;;  %7636 = vmatprep.subr.mxu0 %v8049_v12 }
 0x466   : > { %7624 = vmatmul.mubr.msk.f32.vlgmr.msra.gmra.mxu1 %vm378_vm2, %v2522_v2  ;;  %7629 = vmatmul.mubr.msk.f32.vlgmr.msra.gmra.mxu0 %vm378_vm2, %v2600_v3 }
 0x467   : > { %7633 = vmatprep.mubr.msk.f32.mxu1 %vm8050_vm1, %v8049_v12  ;;  %7638 = vmatprep.mubr.msk.f32.mxu0 %vm8050_vm1, %v8049_v12 }
 0x512   : > { %v7575_v5 = vpop.f32.mrf.mxu1  ;;  %v7580_v6 = vpop.f32.mrf.mxu0 }
 0x513   : > { %v1788_v7 = vadd.f32 %v7575_v5, %v8416_v4 }
 0x514   : > { %v1772_v8 = vpop.f32.mrf.mxu1  ;;  %v1866_v9 = vpop.f32.mrf.mxu0 }
 0x515   : > { %v1876_v10 = vadd.f32 %v7580_v6, %v1788_v7  ;;  %v1787_v11 = vadd.f32 %v8416_v4, %v1772_v8 }
 0x516   : > { %v7585_v13 = vpop.f32.mrf.mxu1  ;;  %v7590_v14 = vpop.f32.mrf.mxu0 }
 0x517   : > { %v1875_v15 = vadd.f32 %v1866_v9, %v1787_v11  ;;  %v1964_v25 = vadd.f32 %v7585_v13, %v1876_v10 }
 0x518   : > { %v1954_v27 = vpop.f32.mrf.mxu1  ;;  %v2042_v30 = vpop.f32.mrf.mxu0 }
 0x519   : > { %v2052_v31 = vadd.f32 %v7590_v14, %v1964_v25  ;;  %v1963_v32 = vadd.f32 %v1954_v27, %v1875_v15 }
 0x51a   : > { %v2127_v33 = vpop.f32.mrf.mxu1  ;;  %v2205_v34 = vpop.f32.mrf.mxu0 }
 0x51b   : > { %7070 = vst.msk [vmem:[%s8425_s27 + $0x8] sm:$0xff] %vm244_vm0, %v2052_v31  ;;  %v2051_v35 = vadd.f32 %v2042_v30, %v1963_v32  ;;  %v2680_v36 = vsel %vm378_vm2, %v2205_v34, -inf  ;;  %v2677_v37 = vsel %vm378_vm2, %v2127_v33, -inf }
 0x51c   : > { %2681 = vmax.xlane.f32.xlu1 %v2680_v36  ;;  %v7600_v38 = vpop.f32.mrf.mxu0  ;;  %2678 = vmax.xlane.f32.xlu0 %v2677_v37  ;;  %v7595_v39 = vpop.f32.mrf.mxu1 }
 0x51d   : > { %7069 = vst.msk [vmem:[%s8425_s27] sm:$0xff] %vm244_vm0, %v2051_v35 }
 0x51e   : > { %v2283_v40 = vpop.f32.mrf.mxu1  ;;  %v2361_v41 = vpop.f32.mrf.mxu0 }
 0x51f   : > { %v2683_v42 = vsel %vm378_vm2, %v2283_v40, -inf  ;;  %v2686_v47 = vsel %vm378_vm2, %v2361_v41, -inf }
 0x520   : > { %v7610_v43 = vpop.f32.mrf.mxu0  ;;  %2684 = vmax.xlane.f32.xlu0 %v2683_v42  ;;  %v7605_v44 = vpop.f32.mrf.mxu1 }
 0x522   : > { %v2439_v45 = vpop.f32.mrf.mxu1  ;;  %v2517_v46 = vpop.f32.mrf.mxu0 }
 0x523   : > { %v2689_v48 = vsel %vm378_vm2, %v2439_v45, -inf  ;;  %v2692_v53 = vsel %vm378_vm2, %v2517_v46, -inf }
 0x524   : > { %v7620_v49 = vpop.f32.mrf.mxu0  ;;  %2687 = vmax.xlane.f32.xlu0 %v2686_v47  ;;  %2690 = vmax.xlane.f32.xlu1 %v2689_v48  ;;  %v7615_v50 = vpop.f32.mrf.mxu1 }
 0x526   : > { %v2595_v51 = vpop.f32.mrf.mxu1  ;;  %v2673_v52 = vpop.f32.mrf.mxu0 }
 0x527   : > { %v2695_v54 = vsel %vm378_vm2, %v2595_v51, -inf  ;;  %v2698_v57 = vsel %vm378_vm2, %v2673_v52, -inf }
 0x528   : > { %v7630_v55 = vpop.f32.mrf.mxu0  ;;  %2693 = vmax.xlane.f32.xlu0 %v2692_v53  ;;  %2696 = vmax.xlane.f32.xlu1 %v2695_v54  ;;  %v7625_v56 = vpop.f32.mrf.mxu1 }
 0x52c   : > { %2699 = vmax.xlane.f32.xlu0 %v2698_v57 }
 0x539   : > { %2765 = vrot.lane.b32.xlu1 %v8137_v16, %s8055_s19 }
 0x53d   : > { %2917 = vrot.lane.b32.xlu1 %v8142_v20, %s8055_s19 }
 0x541   : > { %2993 = vrot.lane.b32.xlu1 %v8146_v23, %s8055_s19 }
 0x542   : > { %2841 = vrot.lane.b32.xlu0 %v8140_v19, %s8055_s19 }
 0x545   : > { %3145 = vrot.lane.b32.xlu1 %v8151_v26, %s8055_s19 }
 0x546   : > { %3069 = vrot.lane.b32.xlu0 %v8148_v24, %s8055_s19 }
 0x5a5   : > { %v2682_v58 = vpop.xlane.xlu1 %2681  ;;  %v2679_v59 = vpop.xlane.xlu0 %2678 }
 0x5a6   : > { %v2702_v60 = vsub.f32 %v2205_v34, %v2682_v58  ;;  %v2701_v61 = vsub.f32 %v2127_v33, %v2679_v59 }
 0x5a8   : > { %v2711_v62 = vmul.f32 1.442695, %v2702_v60  ;;  %v2709_v63 = vmul.f32 1.442695, %v2701_v61 }
 0x5a9   : > { %v2685_v0 = vpop.xlane.xlu0 %2684 }
 0x5aa   : > { %7944 = vpow2.f32 %v2711_v62  ;;  %v2703_v1 = vsub.f32 %v2283_v40, %v2685_v0 }
 0x5ab   : > { %7946 = vpow2.f32 %v2709_v63 }
 0x5ac   : > { %v2713_v2 = vmul.f32 1.442695, %v2703_v1 }
 0x5ad   : > { %v2691_v3 = vpop.xlane.xlu1 %2690  ;;  %v2688_v5 = vpop.xlane.xlu0 %2687 }
 0x5ae   : > { %7948 = vpow2.f32 %v2713_v2  ;;  %v2705_v6 = vsub.f32 %v2439_v45, %v2691_v3  ;;  %v2704_v7 = vsub.f32 %v2361_v41, %v2688_v5 }
 0x5b0   : > { %v2717_v8 = vmul.f32 1.442695, %v2705_v6  ;;  %v2715_v9 = vmul.f32 1.442695, %v2704_v7 }
 0x5b1   : > { %v2697_v10 = vpop.xlane.xlu1 %2696  ;;  %v2694_v11 = vpop.xlane.xlu0 %2693 }
 0x5b2   : > { %7950 = vpow2.f32 %v2717_v8  ;;  %v2707_v13 = vsub.f32 %v2595_v51, %v2697_v10  ;;  %v2706_v14 = vsub.f32 %v2517_v46, %v2694_v11 }
 0x5b3   : > { %7952 = vpow2.f32 %v2715_v9 }
 0x5b4   : > { %v2721_v15 = vmul.f32 1.442695, %v2707_v13  ;;  %v2719_v25 = vmul.f32 1.442695, %v2706_v14 }
 0x5b5   : > { %v2766_v27 = vpop.permute.xlu1 %2765  ;;  %v2700_v30 = vpop.xlane.xlu0 %2699 }
 0x5b6   : > { %7954 = vpow2.f32 %v2721_v15  ;;  %v2708_v31 = vsub.f32 %v2673_v52, %v2700_v30  ;;  %7632 = vmatpush3.msra.mxu1 %v2766_v27 }
 0x5b7   : > { %v8451_v32 = vpop.eup %7944  ;;  %7956 = vpow2.f32 %v2719_v25  ;;  %7641 = vmatprep.subr.mxu1 %v8049_v12 }
 0x5b8   : > { %v8454_v33 = vpop.eup %7946  ;;  %v2723_v34 = vmul.f32 1.442695, %v2708_v31  ;;  %v2728_v35 = vsel %vm378_vm2, %v8451_v32, 0.0 }
 0x5b9   : > { %2729 = vadd.xlane.f32.xlu0 %v2728_v35  ;;  %v2725_v36 = vsel %vm378_vm2, %v8454_v33, 0.0  ;;  %v2842_v37 = vpop.permute.xlu0 %2841  ;;  %v2918_v50 = vpop.permute.xlu1 %2917 }
 0x5ba   : > { %7958 = vpow2.f32 %v2723_v34  ;;  %2726 = vadd.xlane.f32.xlu1 %v2725_v36  ;;  %7637 = vmatpush3.msra.mxu0 %v2842_v37 }
 0x5bb   : > { %v8460_v38 = vpop.eup %7948  ;;  %7646 = vmatprep.subr.mxu0 %v8049_v12 }
 0x5bc   : > { %v2731_v39 = vsel %vm378_vm2, %v8460_v38, 0.0 }
 0x5bd   : > { %v2994_v51 = vpop.permute.xlu1 %2993  ;;  %v3070_v52 = vpop.permute.xlu0 %3069 }
 0x5be   : > { %2732 = vadd.xlane.f32.xlu1 %v2731_v39 }
 0x5bf   : > { %v8465_v40 = vpop.eup %7950 }
 0x5c0   : > { %v8467_v41 = vpop.eup %7952  ;;  %v2737_v42 = vsel %vm378_vm2, %v8465_v40, 0.0 }
 0x5c1   : > { %v2734_v43 = vsel %vm378_vm2, %v8467_v41, 0.0  ;;  %v3146_v53 = vpop.permute.xlu1 %3145 }
 0x5c2   : > { %2738 = vadd.xlane.f32.xlu1 %v2737_v42  ;;  %2735 = vadd.xlane.f32.xlu0 %v2734_v43 }
 0x5c3   : > { %v8473_v44 = vpop.eup %7954 }
 0x5c4   : > { %v8475_v45 = vpop.eup %7956  ;;  %v2743_v46 = vsel %vm378_vm2, %v8473_v44, 0.0 }
 0x5c5   : > { %v2740_v47 = vsel %vm378_vm2, %v8475_v45, 0.0 }
 0x5c6   : > { %2744 = vadd.xlane.f32.xlu1 %v2743_v46  ;;  %2741 = vadd.xlane.f32.xlu0 %v2740_v47 }
 0x5c7   : > { %v8481_v48 = vpop.eup %7958 }
 0x5c8   : > { %v2746_v49 = vsel %vm378_vm2, %v8481_v48, 0.0 }
 0x5ca   : > { %2747 = vadd.xlane.f32.xlu0 %v2746_v49 }
 0x5d7   : > { %3297 = vrot.lane.b32.xlu1 %v8157_v29, %s8055_s19 }
 0x5db   : > { %3805 = vrot.lane.b32.xlu1 %v8140_v19, %s8056_s28 }
 0x5df   : > { %3803 = vrot.lane.b32.xlu1 %v8140_v19, %s8057_s29 }
 0x5e0   : > { %3221 = vrot.lane.b32.xlu0 %v8154_v28, %s8055_s19 }
 0x5e3   : > { %3961 = vrot.lane.b32.xlu1 %v8146_v23, %s8056_s28 }
 0x5e4   : > { %3727 = vrot.lane.b32.xlu0 %v8137_v16, %s8056_s28 }
 0x5e7   : > { %3959 = vrot.lane.b32.xlu1 %v8146_v23, %s8057_s29 }
 0x5e8   : > { %3725 = vrot.lane.b32.xlu0 %v8137_v16, %s8057_s29 }
 0x5eb   : > { %4117 = vrot.lane.b32.xlu1 %v8151_v26, %s8056_s28 }
 0x5ec   : > { %3883 = vrot.lane.b32.xlu0 %v8142_v20, %s8056_s28 }
 0x5ef   : > { %4115 = vrot.lane.b32.xlu1 %v8151_v26, %s8057_s29 }
 0x5f0   : > { %3881 = vrot.lane.b32.xlu0 %v8142_v20, %s8057_s29 }
 0x5f3   : > { %4273 = vrot.lane.b32.xlu1 %v8157_v29, %s8056_s28 }
 0x5f4   : > { %4039 = vrot.lane.b32.xlu0 %v8148_v24, %s8056_s28 }
 0x5f7   : > { %4271 = vrot.lane.b32.xlu1 %v8157_v29, %s8057_s29 }
 0x5f8   : > { %4037 = vrot.lane.b32.xlu0 %v8148_v24, %s8057_s29 }
 0x5fc   : > { %4195 = vrot.lane.b32.xlu0 %v8154_v28, %s8056_s28 }
 0x600   : > { %4193 = vrot.lane.b32.xlu0 %v8154_v28, %s8057_s29 }
 0x642   : > { %v2730_v54 = vpop.xlane.xlu0 %2729 }
 0x643   : > { %v2727_v55 = vpop.xlane.xlu1 %2726  ;;  %7960 = vrcp.f32 %v2730_v54 }
 0x644   : > { %7962 = vrcp.f32 %v2727_v55 }
 0x647   : > { %v2733_v56 = vpop.xlane.xlu1 %2732 }
 0x648   : > { %7964 = vrcp.f32 %v2733_v56 }
 0x64b   : > { %v2739_v57 = vpop.xlane.xlu1 %2738  ;;  %v2736_v58 = vpop.xlane.xlu0 %2735 }
 0x64c   : > { %7966 = vrcp.f32 %v2739_v57 }
 0x64d   : > { %7968 = vrcp.f32 %v2736_v58 }
 0x64f   : > { %v2745_v59 = vpop.xlane.xlu1 %2744  ;;  %v2742_v60 = vpop.xlane.xlu0 %2741 }
 0x650   : > { %v7961_v61 = vpop.eup %7960  ;;  %7970 = vrcp.f32 %v2745_v59 }
 0x651   : > { %v7963_v62 = vpop.eup %7962  ;;  %7972 = vrcp.f32 %v2742_v60  ;;  %v2758_v63 = vmul.f32 %v7961_v61, %v8451_v32 }
 0x652   : > { %v2757_v0 = vmul.f32 %v7963_v62, %v8454_v33 }
 0x653   : > { %v2748_v1 = vpop.xlane.xlu0 %2747  ;;  %7639 = vmatmul.mubr.msk.f32.vlgmr.msra.gmra.mxu0 %vm378_vm2, %v2758_v63  ;;  %v3298_v25 = vpop.permute.xlu1 %3297 }
 0x654   : > { %7974 = vrcp.f32 %v2748_v1  ;;  %7634 = vmatmul.mubr.msk.f32.vlgmr.msra.gmra.mxu1 %vm378_vm2, %v2757_v0  ;;  %7647 = vmatpush3.msra.mxu0 %v2994_v51 }
 0x655   : > { %v7965_v2 = vpop.eup %7964  ;;  %7642 = vmatpush3.msra.mxu1 %v2918_v50  ;;  %7643 = vmatprep.mubr.msk.f32.mxu1 %vm8050_vm1, %v8049_v12 }
 0x656   : > { %7651 = vmatprep.subr.mxu1 %v8049_v12  ;;  %v2759_v3 = vmul.f32 %v7965_v2, %v8460_v38  ;;  %7648 = vmatprep.mubr.msk.f32.mxu0 %vm8050_vm1, %v8049_v12 }
 0x657   : > { %7656 = vmatprep.subr.mxu0 %v8049_v12  ;;  %v3222_v9 = vpop.permute.xlu0 %3221  ;;  %v3806_v32 = vpop.permute.xlu1 %3805 }
 0x658   : > { %7644 = vmatmul.mubr.msk.f32.vlgmr.msra.gmra.mxu1 %vm378_vm2, %v2759_v3 }
 0x659   : > { %v7967_v5 = vpop.eup %7966  ;;  %7652 = vmatpush3.msra.mxu1 %v3070_v52  ;;  %7653 = vmatprep.mubr.msk.f32.mxu1 %vm8050_vm1, %v8049_v12 }
 0x65a   : > { %v7969_v6 = vpop.eup %7968  ;;  %7661 = vmatprep.subr.mxu1 %v8049_v12  ;;  %v2761_v7 = vmul.f32 %v7967_v5, %v8465_v40 }
 0x65b   : > { %v2760_v8 = vmul.f32 %v7969_v6, %v8467_v41  ;;  %v3728_v34 = vpop.permute.xlu0 %3727  ;;  %v3804_v37 = vpop.permute.xlu1 %3803 }
 0x65c   : > { %7654 = vmatmul.mubr.msk.f32.vlgmr.msra.gmra.mxu1 %vm378_vm2, %v2761_v7 }
 0x65d   : > { %v7971_v10 = vpop.eup %7970  ;;  %7649 = vmatmul.mubr.msk.f32.vlgmr.msra.gmra.mxu0 %vm378_vm2, %v2760_v8  ;;  %7662 = vmatpush3.msra.mxu1 %v3222_v9 }
 0x65e   : > { %v7973_v11 = vpop.eup %7972  ;;  %7657 = vmatpush3.msra.mxu0 %v3146_v53  ;;  %7658 = vmatprep.mubr.msk.f32.mxu0 %vm8050_vm1, %v8049_v12  ;;  %v2763_v13 = vmul.f32 %v7971_v10, %v8473_v44 }
 0x65f   : > { %7663 = vmatprep.mubr.msk.f32.mxu1 %vm8050_vm1, %v8049_v12  ;;  %7666 = vmatprep.subr.mxu0 %v8049_v12  ;;  %v2762_v14 = vmul.f32 %v7973_v11, %v8475_v45  ;;  %v3726_v39 = vpop.permute.xlu0 %3725  ;;  %v3962_v44 = vpop.permute.xlu1 %3961 }
 0x660   : > { %7664 = vmatmul.mubr.msk.f32.vlgmr.msra.gmra.mxu1 %vm378_vm2, %v2763_v13  ;;  %7671 = vmatprep.subr.mxu1 %v8326_v17 }
 0x661   : > { %v7975_v15 = vpop.eup %7974  ;;  %7659 = vmatmul.mubr.msk.f32.vlgmr.msra.gmra.mxu0 %vm378_vm2, %v2762_v14  ;;  %7672 = vmatpush3.msra.mxu1 %v8326_v17 }
 0x662   : > { %7667 = vmatpush3.msra.mxu0 %v3298_v25  ;;  %7668 = vmatprep.mubr.msk.f32.mxu0 %vm8050_vm1, %v8049_v12  ;;  %v2764_v27 = vmul.f32 %v7975_v15, %v8481_v48 }
 0x663   : > { %7676 = vmatprep.subr.mxu0 %v8331_v18  ;;  %7681 = vmatprep.subr.mxu1 %v8340_v21  ;;  %v3884_v46 = vpop.permute.xlu0 %3883  ;;  %v3960_v52 = vpop.permute.xlu1 %3959 }
 0x665   : > { %7669 = vmatmul.mubr.msk.f32.vlgmr.msra.gmra.mxu0 %vm378_vm2, %v2764_v27 }
 0x666   : > { %7677 = vmatpush3.msra.mxu0 %v8331_v18 }
 0x667   : > { %7686 = vmatprep.subr.mxu0 %v8346_v22  ;;  %v3882_v53 = vpop.permute.xlu0 %3881  ;;  %v4118_v57 = vpop.permute.xlu1 %4117 }
 0x66b   : > { %v4040_v58 = vpop.permute.xlu0 %4039 }
 0x713   : > { %v2913_v30 = vpop.f32.mrf.mxu0 }
 0x714   : > { %v2837_v31 = vpop.f32.mrf.mxu1  ;;  %3374 = vst.msk [vmem:[#allocation2 + $0x8] sm:$0xff] %vm378_vm2, %v2913_v30 }
 0x715   : > { %3373 = vst.msk [vmem:[#allocation2] sm:$0xff] %vm378_vm2, %v2837_v31  ;;  %v7640_v17 = vpop.f32.mrf.mxu0 }
 0x716   : > { %v7635_v33 = vpop.f32.mrf.mxu1 }
 0x718   : > { %v2989_v35 = vpop.f32.mrf.mxu1 }
 0x719   : > { %3375 = vst.msk [vmem:[#allocation2 + $0x10] sm:$0xff] %vm378_vm2, %v2989_v35 }
 0x71a   : > { %v7645_v36 = vpop.f32.mrf.mxu1 }
 0x71c   : > { %v3141_v38 = vpop.f32.mrf.mxu1 }
 0x71d   : > { %v3065_v18 = vpop.f32.mrf.mxu0  ;;  %3377 = vst.msk [vmem:[#allocation2 + $0x20] sm:$0xff] %vm378_vm2, %v3141_v38 }
 0x71e   : > { %3376 = vst.msk [vmem:[#allocation2 + $0x18] sm:$0xff] %vm378_vm2, %v3065_v18  ;;  %v7655_v40 = vpop.f32.mrf.mxu1 }
 0x71f   : > { %v7650_v41 = vpop.f32.mrf.mxu0 }
 0x720   : > { %v3293_v42 = vpop.f32.mrf.mxu1 }
 0x721   : > { %v3217_v43 = vpop.f32.mrf.mxu0  ;;  %3379 = vst.msk [vmem:[#allocation2 + $0x30] sm:$0xff] %vm378_vm2, %v3293_v42 }
 0x722   : > { %3378 = vst.msk [vmem:[#allocation2 + $0x28] sm:$0xff] %vm378_vm2, %v3217_v43  ;;  %v7665_v45 = vpop.f32.mrf.mxu1 }
 0x723   : > { %v7660_v47 = vpop.f32.mrf.mxu0 }
 0x725   : > { %v3369_v48 = vpop.f32.mrf.mxu0  ;;  %v3381_v49 = vld [vmem:[#allocation2] ss:$4 sm:$0xff]  ;;  %v3467_v50 = vld [vmem:[#allocation2 + $0x1] ss:$4 sm:$0xff]  ;;  %v3553_v56 = vld [vmem:[#allocation2 + $0x2] ss:$4 sm:$0xff] }
 0x726   : > { %3380 = vst.msk [vmem:[#allocation2 + $0x38] sm:$0xff] %vm378_vm2, %v3369_v48  ;;  %7673 = vmatprep.mubr.msk.f32.mxu1 %vm378_vm2, %v3381_v49  ;;  %7678 = vmatprep.mubr.msk.f32.mxu0 %vm378_vm2, %v3467_v50  ;;  %v3639_v59 = vld [vmem:[#allocation2 + $0x3] ss:$4 sm:$0xff] }
 0x727   : > { %v7670_v51 = vpop.f32.mrf.mxu0 }
 0x72d   : > { %v3382_v54 = vld [vmem:[#allocation2 + $0x20] ss:$4 sm:$0xff]  ;;  %v3468_v55 = vld [vmem:[#allocation2 + $0x21] ss:$4 sm:$0xff]  ;;  %v3554_v60 = vld [vmem:[#allocation2 + $0x22] ss:$4 sm:$0xff] }
 0x72e   : > { %7674 = vmatmul.mubr.msk.f32.vlgmr.msra.gmra.mxu1 %vm378_vm2, %v3382_v54  ;;  %7679 = vmatmul.mubr.msk.f32.vlgmr.msra.gmra.mxu0 %vm378_vm2, %v3468_v55  ;;  %v3640_v61 = vld [vmem:[#allocation2 + $0x23] ss:$4 sm:$0xff] }
 0x72f   : > { %7682 = vmatpush3.msra.mxu1 %v8340_v21  ;;  %7683 = vmatprep.mubr.msk.f32.mxu1 %vm378_vm2, %v3553_v56  ;;  %v4116_v21 = vpop.permute.xlu1 %4115 }
 0x730   : > { %7688 = vmatprep.mubr.msk.f32.mxu0 %vm378_vm2, %v3639_v59  ;;  %7687 = vmatpush3.msra.mxu0 %v8346_v22  ;;  %v4038_v22 = vpop.permute.xlu0 %4037 }
 0x731   : > { %7691 = vmatprep.subr.mxu1 %v8049_v12  ;;  %7696 = vmatprep.subr.mxu0 %v8049_v12 }
 0x732   : > { %7684 = vmatmul.mubr.msk.f32.vlgmr.msra.gmra.mxu1 %vm378_vm2, %v3554_v60  ;;  %7689 = vmatmul.mubr.msk.f32.vlgmr.msra.gmra.mxu0 %vm378_vm2, %v3640_v61 }
 0x733   : > { %7692 = vmatpush3.xpose.msk.msra.mxu1 %vm378_vm2, %v3728_v34  ;;  %7697 = vmatpush3.xpose.msk.msra.mxu0 %vm378_vm2, %v3806_v32  ;;  %v4274_v62 = vpop.permute.xlu1 %4273 }
 0x734   : > { %7693 = vmatprep.mubr.msk.f32.mxu1 %vm8050_vm1, %v8049_v12  ;;  %7698 = vmatprep.mubr.msk.f32.mxu0 %vm8050_vm1, %v8049_v12  ;;  %v4196_v63 = vpop.permute.xlu0 %4195 }
 0x735   : > { %7701 = vmatprep.subr.mxu1 %v8049_v12  ;;  %7706 = vmatprep.subr.mxu0 %v8049_v12 }
 0x736   : > { %7694 = vmatmul.mubr.msk.f32.vlgmr.msra.gmra.mxu1 %vm378_vm2, %v3726_v39  ;;  %7699 = vmatmul.mubr.msk.f32.vlgmr.msra.gmra.mxu0 %vm378_vm2, %v3804_v37 }
 0x737   : > { %7702 = vmatpush3.xpose.msk.msra.mxu1 %vm378_vm2, %v3884_v46  ;;  %7707 = vmatpush3.xpose.msk.msra.mxu0 %vm378_vm2, %v3962_v44  ;;  %v4272_v0 = vpop.permute.xlu1 %4271 }
 0x738   : > { %7703 = vmatprep.mubr.msk.f32.mxu1 %vm8050_vm1, %v8049_v12  ;;  %7708 = vmatprep.mubr.msk.f32.mxu0 %vm8050_vm1, %v8049_v12  ;;  %v4194_v1 = vpop.permute.xlu0 %4193 }
 0x739   : > { %7711 = vmatprep.subr.mxu1 %v8049_v12  ;;  %7716 = vmatprep.subr.mxu0 %v8049_v12 }
 0x73a   : > { %7704 = vmatmul.mubr.msk.f32.vlgmr.msra.gmra.mxu1 %vm378_vm2, %v3882_v53  ;;  %7709 = vmatmul.mubr.msk.f32.vlgmr.msra.gmra.mxu0 %vm378_vm2, %v3960_v52 }
 0x73b   : > { %7712 = vmatpush3.xpose.msk.msra.mxu1 %vm378_vm2, %v4040_v58  ;;  %7717 = vmatpush3.xpose.msk.msra.mxu0 %vm378_vm2, %v4118_v57 }
 0x73c   : > { %7713 = vmatprep.mubr.msk.f32.mxu1 %vm8050_vm1, %v8049_v12  ;;  %7718 = vmatprep.mubr.msk.f32.mxu0 %vm8050_vm1, %v8049_v12 }
 0x73d   : > { %7721 = vmatprep.subr.mxu1 %v8049_v12  ;;  %7726 = vmatprep.subr.mxu0 %v8049_v12 }
 0x73e   : > { %7714 = vmatmul.mubr.msk.f32.vlgmr.msra.gmra.mxu1 %vm378_vm2, %v4038_v22  ;;  %7719 = vmatmul.mubr.msk.f32.vlgmr.msra.gmra.mxu0 %vm378_vm2, %v4116_v21 }
 0x73f   : > { %7722 = vmatpush3.xpose.msk.msra.mxu1 %vm378_vm2, %v4196_v63  ;;  %7727 = vmatpush3.xpose.msk.msra.mxu0 %vm378_vm2, %v4274_v62 }
 0x740   : > { %7723 = vmatprep.mubr.msk.f32.mxu1 %vm8050_vm1, %v8049_v12  ;;  %7728 = vmatprep.mubr.msk.f32.mxu0 %vm8050_vm1, %v8049_v12 }
 0x741   : > { %7731 = vmatprep.subr.mxu1 %v8049_v12  ;;  %7736 = vmatprep.subr.mxu0 %v8049_v12 }
 0x742   : > { %7724 = vmatmul.mubr.msk.f32.vlgmr.msra.gmra.mxu1 %vm378_vm2, %v4194_v1  ;;  %7729 = vmatmul.mubr.msk.f32.vlgmr.msra.gmra.mxu0 %vm378_vm2, %v4272_v0 }
 0x743   : > { %7733 = vmatprep.mubr.msk.f32.mxu1 %vm8050_vm1, %v8049_v12  ;;  %7738 = vmatprep.mubr.msk.f32.mxu0 %vm8050_vm1, %v8049_v12 }
 0x7ee   : > { %v7675_v2 = vpop.f32.mrf.mxu1  ;;  %v7680_v3 = vpop.f32.mrf.mxu0 }
 0x7ef   : > { %v3466_v5 = vadd.f32 %v7675_v2, %v8416_v4 }
 0x7f0   : > { %v3456_v6 = vpop.f32.mrf.mxu1  ;;  %v3542_v7 = vpop.f32.mrf.mxu0 }
 0x7f1   : > { %v3552_v8 = vadd.f32 %v7680_v3, %v3466_v5  ;;  %v3465_v9 = vadd.f32 %v8416_v4, %v3456_v6 }
 0x7f2   : > { %v7685_v10 = vpop.f32.mrf.mxu1  ;;  %v7690_v11 = vpop.f32.mrf.mxu0 }
 0x7f3   : > { %v3551_v13 = vadd.f32 %v3542_v7, %v3465_v9  ;;  %v3638_v14 = vadd.f32 %v7685_v10, %v3552_v8 }
 0x7f4   : > { %v3628_v15 = vpop.f32.mrf.mxu1  ;;  %v3714_v25 = vpop.f32.mrf.mxu0 }
 0x7f5   : > { %v3724_v27 = vadd.f32 %v7690_v11, %v3638_v14  ;;  %v3637_v30 = vadd.f32 %v3628_v15, %v3551_v13 }
 0x7f6   : > { %v3799_v31 = vpop.f32.mrf.mxu1  ;;  %v3877_v17 = vpop.f32.mrf.mxu0 }
 0x7f7   : > { %7072 = vst.msk [vmem:[%s8425_s27 + $0x18] sm:$0xff] %vm244_vm0, %v3724_v27  ;;  %v3723_v32 = vadd.f32 %v3714_v25, %v3637_v30  ;;  %v4352_v33 = vsel %vm378_vm2, %v3877_v17, -inf  ;;  %v4349_v34 = vsel %vm378_vm2, %v3799_v31, -inf }
 0x7f8   : > { %4353 = vmax.xlane.f32.xlu1 %v4352_v33  ;;  %v7700_v4 = vpop.f32.mrf.mxu0  ;;  %4350 = vmax.xlane.f32.xlu0 %v4349_v34  ;;  %v7695_v35 = vpop.f32.mrf.mxu1 }
 0x7f9   : > { %7071 = vst.msk [vmem:[%s8425_s27 + $0x10] sm:$0xff] %vm244_vm0, %v3723_v32 }
 0x7fa   : > { %v3955_v36 = vpop.f32.mrf.mxu1  ;;  %v4033_v37 = vpop.f32.mrf.mxu0 }
 0x7fb   : > { %v4355_v38 = vsel %vm378_vm2, %v3955_v36, -inf  ;;  %v4358_v42 = vsel %vm378_vm2, %v4033_v37, -inf }
 0x7fc   : > { %v7710_v39 = vpop.f32.mrf.mxu0  ;;  %4356 = vmax.xlane.f32.xlu0 %v4355_v38  ;;  %v7705_v18 = vpop.f32.mrf.mxu1 }
 0x7fe   : > { %v4111_v40 = vpop.f32.mrf.mxu1  ;;  %v4189_v41 = vpop.f32.mrf.mxu0 }
 0x7ff   : > { %v4361_v43 = vsel %vm378_vm2, %v4111_v40, -inf  ;;  %v4364_v48 = vsel %vm378_vm2, %v4189_v41, -inf }
 0x800   : > { %v7720_v44 = vpop.f32.mrf.mxu0  ;;  %4359 = vmax.xlane.f32.xlu0 %v4358_v42  ;;  %4362 = vmax.xlane.f32.xlu1 %v4361_v43  ;;  %v7715_v45 = vpop.f32.mrf.mxu1 }
 0x802   : > { %v4267_v46 = vpop.f32.mrf.mxu1  ;;  %v4345_v47 = vpop.f32.mrf.mxu0 }
 0x803   : > { %v4367_v49 = vsel %vm378_vm2, %v4267_v46, -inf  ;;  %v4370_v52 = vsel %vm378_vm2, %v4345_v47, -inf }
 0x804   : > { %v7730_v50 = vpop.f32.mrf.mxu0  ;;  %4365 = vmax.xlane.f32.xlu0 %v4364_v48  ;;  %4368 = vmax.xlane.f32.xlu1 %v4367_v49  ;;  %v7725_v51 = vpop.f32.mrf.mxu1 }
 0x808   : > { %4371 = vmax.xlane.f32.xlu0 %v4370_v52 }
 0x815   : > { %4437 = vrot.lane.b32.xlu1 %v8137_v16, %s8058_s30 }
 0x819   : > { %4589 = vrot.lane.b32.xlu1 %v8142_v20, %s8058_s30 }
 0x81d   : > { %4665 = vrot.lane.b32.xlu1 %v8146_v23, %s8058_s30 }
 0x81e   : > { %4513 = vrot.lane.b32.xlu0 %v8140_v19, %s8058_s30 }
 0x821   : > { %4817 = vrot.lane.b32.xlu1 %v8151_v26, %s8058_s30 }
 0x822   : > { %4741 = vrot.lane.b32.xlu0 %v8148_v24, %s8058_s30 }
 0x881   : > { %v4354_v53 = vpop.xlane.xlu1 %4353  ;;  %v4351_v54 = vpop.xlane.xlu0 %4350 }
 0x882   : > { %v4374_v55 = vsub.f32 %v3877_v17, %v4354_v53  ;;  %v4373_v56 = vsub.f32 %v3799_v31, %v4351_v54 }
 0x884   : > { %v4383_v57 = vmul.f32 1.442695, %v4374_v55  ;;  %v4381_v58 = vmul.f32 1.442695, %v4373_v56 }
 0x885   : > { %v4357_v59 = vpop.xlane.xlu0 %4356 }
 0x886   : > { %7976 = vpow2.f32 %v4383_v57  ;;  %v4375_v60 = vsub.f32 %v3955_v36, %v4357_v59 }
 0x887   : > { %7978 = vpow2.f32 %v4381_v58 }
 0x888   : > { %v4385_v61 = vmul.f32 1.442695, %v4375_v60 }
 0x889   : > { %v4363_v21 = vpop.xlane.xlu1 %4362  ;;  %v4360_v22 = vpop.xlane.xlu0 %4359 }
 0x88a   : > { %7980 = vpow2.f32 %v4385_v61  ;;  %v4377_v62 = vsub.f32 %v4111_v40, %v4363_v21  ;;  %v4376_v63 = vsub.f32 %v4033_v37, %v4360_v22 }
 0x88c   : > { %v4389_v0 = vmul.f32 1.442695, %v4377_v62  ;;  %v4387_v1 = vmul.f32 1.442695, %v4376_v63 }
 0x88d   : > { %v4369_v2 = vpop.xlane.xlu1 %4368  ;;  %v4366_v3 = vpop.xlane.xlu0 %4365 }
 0x88e   : > { %7982 = vpow2.f32 %v4389_v0  ;;  %v4379_v5 = vsub.f32 %v4267_v46, %v4369_v2  ;;  %v4378_v6 = vsub.f32 %v4189_v41, %v4366_v3 }
 0x88f   : > { %7984 = vpow2.f32 %v4387_v1 }
 0x890   : > { %v4393_v7 = vmul.f32 1.442695, %v4379_v5  ;;  %v4391_v8 = vmul.f32 1.442695, %v4378_v6  ;;  %v8722_v5 = vld [vmem:[%s8922_s3] sm:$0xff]  ;;  %v8727_v6 = vld [vmem:[%s8922_s3 + $0x8] sm:$0xff] }
 0x891   : > { %v4438_v9 = vpop.permute.xlu1 %4437  ;;  %v4372_v10 = vpop.xlane.xlu0 %4371 }
 0x892   : > { %7986 = vpow2.f32 %v4393_v7  ;;  %v4380_v11 = vsub.f32 %v4345_v47, %v4372_v10  ;;  %7732 = vmatpush3.msra.mxu1 %v4438_v9  ;;  %v8736_v7 = vld [vmem:[%s8922_s3 + $0x10] sm:$0xff] }
 0x893   : > { %v8633_v13 = vpop.eup %7976  ;;  %7988 = vpow2.f32 %v4391_v8  ;;  %7741 = vmatprep.subr.mxu1 %v8049_v12  ;;  %v8742_v8 = vld [vmem:[%s8922_s3 + $0x18] sm:$0xff] }
 0x894   : > { %v8636_v14 = vpop.eup %7978  ;;  %v4395_v15 = vmul.f32 1.442695, %v4380_v11  ;;  %v4400_v25 = vsel %vm378_vm2, %v8633_v13, 0.0 }
 0x895   : > { %4401 = vadd.xlane.f32.xlu0 %v4400_v25  ;;  %v4397_v27 = vsel %vm378_vm2, %v8636_v14, 0.0  ;;  %v4514_v30 = vpop.permute.xlu0 %4513  ;;  %v4590_v40 = vpop.permute.xlu1 %4589 }
 0x896   : > { %7990 = vpow2.f32 %v4395_v15  ;;  %4398 = vadd.xlane.f32.xlu1 %v4397_v27  ;;  %7737 = vmatpush3.msra.mxu0 %v4514_v30 }
 0x897   : > { %v8642_v31 = vpop.eup %7980  ;;  %7746 = vmatprep.subr.mxu0 %v8049_v12 }
 0x898   : > { %v4403_v17 = vsel %vm378_vm2, %v8642_v31, 0.0 }
 0x899   : > { %v4666_v41 = vpop.permute.xlu1 %4665  ;;  %v4742_v42 = vpop.permute.xlu0 %4741 }
 0x89a   : > { %4404 = vadd.xlane.f32.xlu1 %v4403_v17 }
 0x89b   : > { %v8647_v32 = vpop.eup %7982 }
 0x89c   : > { %v8649_v33 = vpop.eup %7984  ;;  %v4409_v34 = vsel %vm378_vm2, %v8647_v32, 0.0 }
 0x89d   : > { %v4406_v4 = vsel %vm378_vm2, %v8649_v33, 0.0  ;;  %v4818_v43 = vpop.permute.xlu1 %4817 }
 0x89e   : > { %4410 = vadd.xlane.f32.xlu1 %v4409_v34  ;;  %4407 = vadd.xlane.f32.xlu0 %v4406_v4 }
 0x89f   : > { %v8655_v35 = vpop.eup %7986 }
 0x8a0   : > { %v8657_v36 = vpop.eup %7988  ;;  %v4415_v37 = vsel %vm378_vm2, %v8655_v35, 0.0 }
 0x8a1   : > { %v4412_v38 = vsel %vm378_vm2, %v8657_v36, 0.0 }
 0x8a2   : > { %4416 = vadd.xlane.f32.xlu1 %v4415_v37  ;;  %4413 = vadd.xlane.f32.xlu0 %v4412_v38 }
 0x8a3   : > { %v8663_v39 = vpop.eup %7990 }
 0x8a4   : > { %v4418_v18 = vsel %vm378_vm2, %v8663_v39, 0.0 }
 0x8a6   : > { %4419 = vadd.xlane.f32.xlu0 %v4418_v18 }
 0x8b3   : > { %4969 = vrot.lane.b32.xlu1 %v8157_v29, %s8058_s30 }
 0x8b7   : > { %5477 = vrot.lane.b32.xlu1 %v8140_v19, %s8059_s6 }
 0x8bb   : > { %5475 = vrot.lane.b32.xlu1 %v8140_v19, %s8060_s7 }
 0x8bc   : > { %4893 = vrot.lane.b32.xlu0 %v8154_v28, %s8058_s30 }
 0x8bf   : > { %5633 = vrot.lane.b32.xlu1 %v8146_v23, %s8059_s6 }
 0x8c0   : > { %5399 = vrot.lane.b32.xlu0 %v8137_v16, %s8059_s6 }
 0x8c3   : > { %5631 = vrot.lane.b32.xlu1 %v8146_v23, %s8060_s7 }
 0x8c4   : > { %5397 = vrot.lane.b32.xlu0 %v8137_v16, %s8060_s7 }
 0x8c7   : > { %5789 = vrot.lane.b32.xlu1 %v8151_v26, %s8059_s6 }
 0x8c8   : > { %5555 = vrot.lane.b32.xlu0 %v8142_v20, %s8059_s6 }
 0x8cb   : > { %5787 = vrot.lane.b32.xlu1 %v8151_v26, %s8060_s7 }
 0x8cc   : > { %5553 = vrot.lane.b32.xlu0 %v8142_v20, %s8060_s7 }
 0x8cf   : > { %5945 = vrot.lane.b32.xlu1 %v8157_v29, %s8059_s6 }
 0x8d0   : > { %5711 = vrot.lane.b32.xlu0 %v8148_v24, %s8059_s6 }
 0x8d3   : > { %5943 = vrot.lane.b32.xlu1 %v8157_v29, %s8060_s7 }
 0x8d4   : > { %5709 = vrot.lane.b32.xlu0 %v8148_v24, %s8060_s7 }
 0x8d8   : > { %5867 = vrot.lane.b32.xlu0 %v8154_v28, %s8059_s6 }
 0x8dc   : > { %5865 = vrot.lane.b32.xlu0 %v8154_v28, %s8060_s7 }
 0x91e   : > { %v4402_v44 = vpop.xlane.xlu0 %4401 }
 0x91f   : > { %v4399_v45 = vpop.xlane.xlu1 %4398  ;;  %7992 = vrcp.f32 %v4402_v44 }
 0x920   : > { %7994 = vrcp.f32 %v4399_v45 }
 0x923   : > { %v4405_v46 = vpop.xlane.xlu1 %4404 }
 0x924   : > { %7996 = vrcp.f32 %v4405_v46 }
 0x927   : > { %v4411_v47 = vpop.xlane.xlu1 %4410  ;;  %v4408_v48 = vpop.xlane.xlu0 %4407 }
 0x928   : > { %7998 = vrcp.f32 %v4411_v47 }
 0x929   : > { %8000 = vrcp.f32 %v4408_v48 }
 0x92b   : > { %v4417_v49 = vpop.xlane.xlu1 %4416  ;;  %v4414_v50 = vpop.xlane.xlu0 %4413 }
 0x92c   : > { %v7993_v51 = vpop.eup %7992  ;;  %8002 = vrcp.f32 %v4417_v49 }
 0x92d   : > { %v7995_v52 = vpop.eup %7994  ;;  %8004 = vrcp.f32 %v4414_v50  ;;  %v4430_v53 = vmul.f32 %v7993_v51, %v8633_v13 }
 0x92e   : > { %v4429_v54 = vmul.f32 %v7995_v52, %v8636_v14 }
 0x92f   : > { %v4420_v55 = vpop.xlane.xlu0 %4419  ;;  %7739 = vmatmul.mubr.msk.f32.vlgmr.msra.gmra.mxu0 %vm378_vm2, %v4430_v53  ;;  %v4970_v2 = vpop.permute.xlu1 %4969 }
 0x930   : > { %8006 = vrcp.f32 %v4420_v55  ;;  %7734 = vmatmul.mubr.msk.f32.vlgmr.msra.gmra.mxu1 %vm378_vm2, %v4429_v54  ;;  %7747 = vmatpush3.msra.mxu0 %v4666_v41 }
 0x931   : > { %v7997_v56 = vpop.eup %7996  ;;  %7742 = vmatpush3.msra.mxu1 %v4590_v40  ;;  %7743 = vmatprep.mubr.msk.f32.mxu1 %vm8050_vm1, %v8049_v12 }
 0x932   : > { %7751 = vmatprep.subr.mxu1 %v8049_v12  ;;  %v4431_v57 = vmul.f32 %v7997_v56, %v8642_v31  ;;  %7748 = vmatprep.mubr.msk.f32.mxu0 %vm8050_vm1, %v8049_v12 }
 0x933   : > { %7756 = vmatprep.subr.mxu0 %v8049_v12  ;;  %v4894_v21 = vpop.permute.xlu0 %4893  ;;  %v5478_v13 = vpop.permute.xlu1 %5477 }
 0x934   : > { %7744 = vmatmul.mubr.msk.f32.vlgmr.msra.gmra.mxu1 %vm378_vm2, %v4431_v57 }
 0x935   : > { %v7999_v58 = vpop.eup %7998  ;;  %7752 = vmatpush3.msra.mxu1 %v4742_v42  ;;  %7753 = vmatprep.mubr.msk.f32.mxu1 %vm8050_vm1, %v8049_v12 }
 0x936   : > { %v8001_v59 = vpop.eup %8000  ;;  %7761 = vmatprep.subr.mxu1 %v8049_v12  ;;  %v4433_v60 = vmul.f32 %v7999_v58, %v8647_v32 }
 0x937   : > { %v4432_v61 = vmul.f32 %v8001_v59, %v8649_v33  ;;  %v5400_v15 = vpop.permute.xlu0 %5399  ;;  %v5476_v30 = vpop.permute.xlu1 %5475 }
 0x938   : > { %7754 = vmatmul.mubr.msk.f32.vlgmr.msra.gmra.mxu1 %vm378_vm2, %v4433_v60 }
 0x939   : > { %v8003_v22 = vpop.eup %8002  ;;  %7749 = vmatmul.mubr.msk.f32.vlgmr.msra.gmra.mxu0 %vm378_vm2, %v4432_v61  ;;  %7762 = vmatpush3.msra.mxu1 %v4894_v21  ;;  %v8812_v61 = vld [vmem:[%s8923_s4] ss:$0 sm:$0xff] }
 0x93a   : > { %v8005_v62 = vpop.eup %8004  ;;  %7757 = vmatpush3.msra.mxu0 %v4818_v43  ;;  %7758 = vmatprep.mubr.msk.f32.mxu0 %vm8050_vm1, %v8049_v12  ;;  %v4435_v63 = vmul.f32 %v8003_v22, %v8655_v35 }
 0x93b   : > { %7763 = vmatprep.mubr.msk.f32.mxu1 %vm8050_vm1, %v8049_v12  ;;  %7766 = vmatprep.subr.mxu0 %v8049_v12  ;;  %v4434_v0 = vmul.f32 %v8005_v62, %v8657_v36  ;;  %v5398_v17 = vpop.permute.xlu0 %5397  ;;  %v5634_v36 = vpop.permute.xlu1 %5633 }
 0x93c   : > { %7764 = vmatmul.mubr.msk.f32.vlgmr.msra.gmra.mxu1 %vm378_vm2, %v4435_v63  ;;  %7771 = vmatprep.subr.mxu1 %v8722_v5 }
 0x93d   : > { %v8007_v1 = vpop.eup %8006  ;;  %7759 = vmatmul.mubr.msk.f32.vlgmr.msra.gmra.mxu0 %vm378_vm2, %v4434_v0  ;;  %7772 = vmatpush3.msra.mxu1 %v8722_v5 }
 0x93e   : > { %7767 = vmatpush3.msra.mxu0 %v4970_v2  ;;  %7768 = vmatprep.mubr.msk.f32.mxu0 %vm8050_vm1, %v8049_v12  ;;  %v4436_v3 = vmul.f32 %v8007_v1, %v8663_v39 }
 0x93f   : > { %7776 = vmatprep.subr.mxu0 %v8727_v6  ;;  %7781 = vmatprep.subr.mxu1 %v8736_v7  ;;  %v5556_v38 = vpop.permute.xlu0 %5555  ;;  %v5632_v43 = vpop.permute.xlu1 %5631 }
 0x941   : > { %7769 = vmatmul.mubr.msk.f32.vlgmr.msra.gmra.mxu0 %vm378_vm2, %v4436_v3 }
 0x942   : > { %7777 = vmatpush3.msra.mxu0 %v8727_v6 }
 0x943   : > { %7786 = vmatprep.subr.mxu0 %v8742_v8  ;;  %v5554_v44 = vpop.permute.xlu0 %5553  ;;  %v5790_v48 = vpop.permute.xlu1 %5789 }
 0x947   : > { %v5712_v49 = vpop.permute.xlu0 %5711  ;;  %v5788_v53 = vpop.permute.xlu1 %5787 }
 0x94b   : > { %v5710_v54 = vpop.permute.xlu0 %5709  ;;  %v5946_v55 = vpop.permute.xlu1 %5945 }
 0x94f   : > { %v5868_v56 = vpop.permute.xlu0 %5867  ;;  %v5944_v57 = vpop.permute.xlu1 %5943 }
 0x953   : > { %v5866_v58 = vpop.permute.xlu0 %5865 }
 0x9ef   : > { %v4585_v9 = vpop.f32.mrf.mxu0 }
 0x9f0   : > { %v4509_v10 = vpop.f32.mrf.mxu1  ;;  %5046 = vst.msk [vmem:[#allocation2 + $0x8] sm:$0xff] %vm378_vm2, %v4585_v9 }
 0x9f1   : > { %5045 = vst.msk [vmem:[#allocation2] sm:$0xff] %vm378_vm2, %v4509_v10  ;;  %v7740_v11 = vpop.f32.mrf.mxu0 }
 0x9f2   : > { %v7735_v14 = vpop.f32.mrf.mxu1 }
 0x9f4   : > { %v4661_v25 = vpop.f32.mrf.mxu1 }
 0x9f5   : > { %5047 = vst.msk [vmem:[#allocation2 + $0x10] sm:$0xff] %vm378_vm2, %v4661_v25 }
 0x9f6   : > { %v7745_v27 = vpop.f32.mrf.mxu1 }
 0x9f8   : > { %v4813_v31 = vpop.f32.mrf.mxu1 }
 0x9f9   : > { %v4737_v32 = vpop.f32.mrf.mxu0  ;;  %5049 = vst.msk [vmem:[#allocation2 + $0x20] sm:$0xff] %vm378_vm2, %v4813_v31 }
 0x9fa   : > { %5048 = vst.msk [vmem:[#allocation2 + $0x18] sm:$0xff] %vm378_vm2, %v4737_v32  ;;  %v7755_v33 = vpop.f32.mrf.mxu1 }
 0x9fb   : > { %v7750_v34 = vpop.f32.mrf.mxu0 }
 0x9fc   : > { %v4965_v4 = vpop.f32.mrf.mxu1 }
 0x9fd   : > { %v4889_v35 = vpop.f32.mrf.mxu0  ;;  %5051 = vst.msk [vmem:[#allocation2 + $0x30] sm:$0xff] %vm378_vm2, %v4965_v4 }
 0x9fe   : > { %5050 = vst.msk [vmem:[#allocation2 + $0x28] sm:$0xff] %vm378_vm2, %v4889_v35  ;;  %v7765_v37 = vpop.f32.mrf.mxu1 }
 0x9ff   : > { %v7760_v39 = vpop.f32.mrf.mxu0 }
 0xa01   : > { %v5041_v18 = vpop.f32.mrf.mxu0  ;;  %v5053_v40 = vld [vmem:[#allocation2] ss:$4 sm:$0xff]  ;;  %v5139_v41 = vld [vmem:[#allocation2 + $0x1] ss:$4 sm:$0xff]  ;;  %v5225_v47 = vld [vmem:[#allocation2 + $0x2] ss:$4 sm:$0xff] }
 0xa02   : > { %5052 = vst.msk [vmem:[#allocation2 + $0x38] sm:$0xff] %vm378_vm2, %v5041_v18  ;;  %7773 = vmatprep.mubr.msk.f32.mxu1 %vm378_vm2, %v5053_v40  ;;  %7778 = vmatprep.mubr.msk.f32.mxu0 %vm378_vm2, %v5139_v41  ;;  %v5311_v50 = vld [vmem:[#allocation2 + $0x3] ss:$4 sm:$0xff] }
 0xa03   : > { %v7770_v42 = vpop.f32.mrf.mxu0 }
 0xa09   : > { %v5054_v45 = vld [vmem:[#allocation2 + $0x20] ss:$4 sm:$0xff]  ;;  %v5140_v46 = vld [vmem:[#allocation2 + $0x21] ss:$4 sm:$0xff]  ;;  %v5226_v51 = vld [vmem:[#allocation2 + $0x22] ss:$4 sm:$0xff] }
 0xa0a   : > { %7774 = vmatmul.mubr.msk.f32.vlgmr.msra.gmra.mxu1 %vm378_vm2, %v5054_v45  ;;  %7779 = vmatmul.mubr.msk.f32.vlgmr.msra.gmra.mxu0 %vm378_vm2, %v5140_v46  ;;  %v5312_v52 = vld [vmem:[#allocation2 + $0x23] ss:$4 sm:$0xff] }
 0xa0b   : > { %7782 = vmatpush3.msra.mxu1 %v8736_v7  ;;  %7783 = vmatprep.mubr.msk.f32.mxu1 %vm378_vm2, %v5225_v47 }
 0xa0c   : > { %7788 = vmatprep.mubr.msk.f32.mxu0 %vm378_vm2, %v5311_v50  ;;  %7787 = vmatpush3.msra.mxu0 %v8742_v8 }
 0xa0d   : > { %7791 = vmatprep.subr.mxu1 %v8049_v12  ;;  %7796 = vmatprep.subr.mxu0 %v8049_v12 }
 0xa0e   : > { %7784 = vmatmul.mubr.msk.f32.vlgmr.msra.gmra.mxu1 %vm378_vm2, %v5226_v51  ;;  %7789 = vmatmul.mubr.msk.f32.vlgmr.msra.gmra.mxu0 %vm378_vm2, %v5312_v52 }
 0xa0f   : > { %7792 = vmatpush3.xpose.msk.msra.mxu1 %vm378_vm2, %v5400_v15  ;;  %7797 = vmatpush3.xpose.msk.msra.mxu0 %vm378_vm2, %v5478_v13 }
 0xa10   : > { %7793 = vmatprep.mubr.msk.f32.mxu1 %vm8050_vm1, %v8049_v12  ;;  %7798 = vmatprep.mubr.msk.f32.mxu0 %vm8050_vm1, %v8049_v12 }
 0xa11   : > { %7801 = vmatprep.subr.mxu1 %v8049_v12  ;;  %7806 = vmatprep.subr.mxu0 %v8049_v12 }
 0xa12   : > { %7794 = vmatmul.mubr.msk.f32.vlgmr.msra.gmra.mxu1 %vm378_vm2, %v5398_v17  ;;  %7799 = vmatmul.mubr.msk.f32.vlgmr.msra.gmra.mxu0 %vm378_vm2, %v5476_v30 }
 0xa13   : > { %7802 = vmatpush3.xpose.msk.msra.mxu1 %vm378_vm2, %v5556_v38  ;;  %7807 = vmatpush3.xpose.msk.msra.mxu0 %vm378_vm2, %v5634_v36 }
 0xa14   : > { %7803 = vmatprep.mubr.msk.f32.mxu1 %vm8050_vm1, %v8049_v12  ;;  %7808 = vmatprep.mubr.msk.f32.mxu0 %vm8050_vm1, %v8049_v12 }
 0xa15   : > { %7811 = vmatprep.subr.mxu1 %v8049_v12  ;;  %7816 = vmatprep.subr.mxu0 %v8049_v12 }
 0xa16   : > { %7804 = vmatmul.mubr.msk.f32.vlgmr.msra.gmra.mxu1 %vm378_vm2, %v5554_v44  ;;  %7809 = vmatmul.mubr.msk.f32.vlgmr.msra.gmra.mxu0 %vm378_vm2, %v5632_v43 }
 0xa17   : > { %7812 = vmatpush3.xpose.msk.msra.mxu1 %vm378_vm2, %v5712_v49  ;;  %7817 = vmatpush3.xpose.msk.msra.mxu0 %vm378_vm2, %v5790_v48 }
 0xa18   : > { %7813 = vmatprep.mubr.msk.f32.mxu1 %vm8050_vm1, %v8049_v12  ;;  %7818 = vmatprep.mubr.msk.f32.mxu0 %vm8050_vm1, %v8049_v12 }
 0xa19   : > { %7821 = vmatprep.subr.mxu1 %v8049_v12  ;;  %7826 = vmatprep.subr.mxu0 %v8049_v12 }
 0xa1a   : > { %7814 = vmatmul.mubr.msk.f32.vlgmr.msra.gmra.mxu1 %vm378_vm2, %v5710_v54  ;;  %7819 = vmatmul.mubr.msk.f32.vlgmr.msra.gmra.mxu0 %vm378_vm2, %v5788_v53 }
 0xa1b   : > { %7822 = vmatpush3.xpose.msk.msra.mxu1 %vm378_vm2, %v5868_v56  ;;  %7827 = vmatpush3.xpose.msk.msra.mxu0 %vm378_vm2, %v5946_v55 }
 0xa1c   : > { %7823 = vmatprep.mubr.msk.f32.mxu1 %vm8050_vm1, %v8049_v12  ;;  %7828 = vmatprep.mubr.msk.f32.mxu0 %vm8050_vm1, %v8049_v12 }
 0xa1d   : > { %7831 = vmatprep.subr.mxu1 %v8049_v12  ;;  %7836 = vmatprep.subr.mxu0 %v8049_v12 }
 0xa1e   : > { %7824 = vmatmul.mubr.msk.f32.vlgmr.msra.gmra.mxu1 %vm378_vm2, %v5866_v58  ;;  %7829 = vmatmul.mubr.msk.f32.vlgmr.msra.gmra.mxu0 %vm378_vm2, %v5944_v57 }
 0xa1f   : > { %7833 = vmatprep.mubr.msk.f32.mxu1 %vm8050_vm1, %v8049_v12  ;;  %7838 = vmatprep.mubr.msk.f32.mxu0 %vm8050_vm1, %v8049_v12 }
 0xaca   : > { %v7775_v59 = vpop.f32.mrf.mxu1  ;;  %v7780_v60 = vpop.f32.mrf.mxu0 }
 0xacb   : > { %v5138_v21 = vadd.f32 %v8812_v61, %v7775_v59 }
 0xacc   : > { %v5128_v22 = vpop.f32.mrf.mxu1  ;;  %v5214_v62 = vpop.f32.mrf.mxu0 }
 0xacd   : > { %v5224_v63 = vadd.f32 %v7780_v60, %v5138_v21  ;;  %v5137_v0 = vadd.f32 %v8812_v61, %v5128_v22 }
 0xace   : > { %v7785_v1 = vpop.f32.mrf.mxu1  ;;  %v7790_v2 = vpop.f32.mrf.mxu0 }
 0xacf   : > { %v5223_v3 = vadd.f32 %v5214_v62, %v5137_v0  ;;  %v5310_v9 = vadd.f32 %v7785_v1, %v5224_v63 }
 0xad0   : > { %v5300_v10 = vpop.f32.mrf.mxu1  ;;  %v5386_v11 = vpop.f32.mrf.mxu0 }
 0xad1   : > { %v5396_v13 = vadd.f32 %v7790_v2, %v5310_v9  ;;  %v5309_v14 = vadd.f32 %v5300_v10, %v5223_v3 }
 0xad2   : > { %v5471_v15 = vpop.f32.mrf.mxu1  ;;  %v5549_v25 = vpop.f32.mrf.mxu0 }
 0xad3   : > { %7074 = vst.msk [vmem:[%s8425_s27 + $0x28] sm:$0xff] %vm244_vm0, %v5396_v13  ;;  %v5395_v27 = vadd.f32 %v5386_v11, %v5309_v14  ;;  %v6024_v30 = vsel %vm378_vm2, %v5549_v25, -inf  ;;  %v6021_v31 = vsel %vm378_vm2, %v5471_v15, -inf }
 0xad4   : > { %6025 = vmax.xlane.f32.xlu1 %v6024_v30  ;;  %v7800_v17 = vpop.f32.mrf.mxu0  ;;  %6022 = vmax.xlane.f32.xlu0 %v6021_v31  ;;  %v7795_v32 = vpop.f32.mrf.mxu1 }
 0xad5   : > { %7073 = vst.msk [vmem:[%s8425_s27 + $0x20] sm:$0xff] %vm244_vm0, %v5395_v27 }
 0xad6   : > { %v5627_v33 = vpop.f32.mrf.mxu1  ;;  %v5705_v34 = vpop.f32.mrf.mxu0 }
 0xad7   : > { %v6027_v4 = vsel %vm378_vm2, %v5627_v33, -inf  ;;  %v6030_v39 = vsel %vm378_vm2, %v5705_v34, -inf }
 0xad8   : > { %v7810_v35 = vpop.f32.mrf.mxu0  ;;  %6028 = vmax.xlane.f32.xlu0 %v6027_v4  ;;  %v7805_v36 = vpop.f32.mrf.mxu1 }
 0xada   : > { %v5783_v37 = vpop.f32.mrf.mxu1  ;;  %v5861_v38 = vpop.f32.mrf.mxu0 }
 0xadb   : > { %v6033_v18 = vsel %vm378_vm2, %v5783_v37, -inf  ;;  %v6036_v44 = vsel %vm378_vm2, %v5861_v38, -inf }
 0xadc   : > { %v7820_v40 = vpop.f32.mrf.mxu0  ;;  %6031 = vmax.xlane.f32.xlu0 %v6030_v39  ;;  %6034 = vmax.xlane.f32.xlu1 %v6033_v18  ;;  %v7815_v41 = vpop.f32.mrf.mxu1 }
 0xade   : > { %v5939_v42 = vpop.f32.mrf.mxu1  ;;  %v6017_v43 = vpop.f32.mrf.mxu0 }
 0xadf   : > { %v6039_v45 = vsel %vm378_vm2, %v5939_v42, -inf  ;;  %v6042_v48 = vsel %vm378_vm2, %v6017_v43, -inf }
 0xae0   : > { %v7830_v46 = vpop.f32.mrf.mxu0  ;;  %6037 = vmax.xlane.f32.xlu0 %v6036_v44  ;;  %6040 = vmax.xlane.f32.xlu1 %v6039_v45  ;;  %v7825_v47 = vpop.f32.mrf.mxu1 }
 0xae4   : > { %6043 = vmax.xlane.f32.xlu0 %v6042_v48 }
 0xaf1   : > { %6109 = vrot.lane.b32.xlu1 %v8137_v16, %s8061_s20 }
 0xaf5   : > { %6261 = vrot.lane.b32.xlu1 %v8142_v20, %s8061_s20 }
 0xaf9   : > { %6337 = vrot.lane.b32.xlu1 %v8146_v23, %s8061_s20 }
 0xafa   : > { %6185 = vrot.lane.b32.xlu0 %v8140_v19, %s8061_s20 }
 0xafd   : > { %6489 = vrot.lane.b32.xlu1 %v8151_v26, %s8061_s20 }
 0xafe   : > { %6413 = vrot.lane.b32.xlu0 %v8148_v24, %s8061_s20 }
 0xb5d   : > { %v6026_v49 = vpop.xlane.xlu1 %6025  ;;  %v6023_v50 = vpop.xlane.xlu0 %6022 }
 0xb5e   : > { %v6046_v51 = vsub.f32 %v5549_v25, %v6026_v49  ;;  %v6045_v52 = vsub.f32 %v5471_v15, %v6023_v50 }
 0xb60   : > { %v6055_v16 = vmul.f32 1.442695, %v6046_v51  ;;  %v6053_v53 = vmul.f32 1.442695, %v6045_v52 }
 0xb61   : > { %v6029_v54 = vpop.xlane.xlu0 %6028 }
 0xb62   : > { %8008 = vpow2.f32 %v6055_v16  ;;  %v6047_v20 = vsub.f32 %v5627_v33, %v6029_v54 }
 0xb63   : > { %8010 = vpow2.f32 %v6053_v53 }
 0xb64   : > { %v6057_v23 = vmul.f32 1.442695, %v6047_v20 }
 0xb65   : > { %v6035_v55 = vpop.xlane.xlu1 %6034  ;;  %v6032_v56 = vpop.xlane.xlu0 %6031 }
 0xb66   : > { %8012 = vpow2.f32 %v6057_v23  ;;  %v6049_v19 = vsub.f32 %v5783_v37, %v6035_v55  ;;  %v6048_v57 = vsub.f32 %v5705_v34, %v6032_v56 }
 0xb68   : > { %v6061_v26 = vmul.f32 1.442695, %v6049_v19  ;;  %v6059_v58 = vmul.f32 1.442695, %v6048_v57 }
 0xb69   : > { %v6041_v59 = vpop.xlane.xlu1 %6040  ;;  %v6038_v24 = vpop.xlane.xlu0 %6037 }
 0xb6a   : > { %8014 = vpow2.f32 %v6061_v26  ;;  %v6051_v60 = vsub.f32 %v5939_v42, %v6041_v59  ;;  %v6050_v21 = vsub.f32 %v5861_v38, %v6038_v24 }
 0xb6b   : > { %8016 = vpow2.f32 %v6059_v58 }
 0xb6c   : > { %v6065_v22 = vmul.f32 1.442695, %v6051_v60  ;;  %v6063_v62 = vmul.f32 1.442695, %v6050_v21 }
 0xb6d   : > { %v6110_v63 = vpop.permute.xlu1 %6109  ;;  %v6044_v0 = vpop.xlane.xlu0 %6043 }
 0xb6e   : > { %8018 = vpow2.f32 %v6065_v22  ;;  %v6052_v1 = vsub.f32 %v6017_v43, %v6044_v0  ;;  %7832 = vmatpush3.msra.mxu1 %v6110_v63 }
 0xb6f   : > { %v8009_v2 = vpop.eup %8008  ;;  %8020 = vpow2.f32 %v6063_v62  ;;  %7841 = vmatprep.subr.mxu1 %v8049_v12 }
 0xb70   : > { %v8011_v3 = vpop.eup %8010  ;;  %v6067_v9 = vmul.f32 1.442695, %v6052_v1  ;;  %v6072_v10 = vsel %vm378_vm2, %v8009_v2, 0.0 }
 0xb71   : > { %6073 = vadd.xlane.f32.xlu0 %v6072_v10  ;;  %v6069_v11 = vsel %vm378_vm2, %v8011_v3, 0.0  ;;  %v6186_v13 = vpop.permute.xlu0 %6185  ;;  %v6262_v36 = vpop.permute.xlu1 %6261 }
 0xb72   : > { %8022 = vpow2.f32 %v6067_v9  ;;  %6070 = vadd.xlane.f32.xlu1 %v6069_v11  ;;  %7837 = vmatpush3.msra.mxu0 %v6186_v13 }
 0xb73   : > { %v8013_v14 = vpop.eup %8012  ;;  %7846 = vmatprep.subr.mxu0 %v8049_v12 }
 0xb74   : > { %v6075_v15 = vsel %vm378_vm2, %v8013_v14, 0.0 }
 0xb75   : > { %v6338_v37 = vpop.permute.xlu1 %6337  ;;  %v6414_v38 = vpop.permute.xlu0 %6413 }
 0xb76   : > { %6076 = vadd.xlane.f32.xlu1 %v6075_v15 }
 0xb77   : > { %v8015_v25 = vpop.eup %8014 }
 0xb78   : > { %v8017_v27 = vpop.eup %8016  ;;  %v6081_v30 = vsel %vm378_vm2, %v8015_v25, 0.0 }
 0xb79   : > { %v6078_v31 = vsel %vm378_vm2, %v8017_v27, 0.0  ;;  %v6490_v39 = vpop.permute.xlu1 %6489 }
 0xb7a   : > { %6082 = vadd.xlane.f32.xlu1 %v6081_v30  ;;  %6079 = vadd.xlane.f32.xlu0 %v6078_v31 }
 0xb7b   : > { %v8019_v17 = vpop.eup %8018 }
 0xb7c   : > { %v8847_v32 = vpop.eup %8020  ;;  %v6087_v33 = vsel %vm378_vm2, %v8019_v17, 0.0 }
 0xb7d   : > { %v6084_v34 = vsel %vm378_vm2, %v8847_v32, 0.0 }
 0xb7e   : > { %6088 = vadd.xlane.f32.xlu1 %v6087_v33  ;;  %6085 = vadd.xlane.f32.xlu0 %v6084_v34 }
 0xb7f   : > { %v8852_v4 = vpop.eup %8022 }
 0xb80   : > { %v6090_v35 = vsel %vm378_vm2, %v8852_v4, 0.0 }
 0xb82   : > { %6091 = vadd.xlane.f32.xlu0 %v6090_v35 }
 0xb8f   : > { %6641 = vrot.lane.b32.xlu1 %v8157_v29, %s8061_s20 }
 0xb98   : > { %6565 = vrot.lane.b32.xlu0 %v8154_v28, %s8061_s20 }
 0xbfa   : > { %v6074_v18 = vpop.xlane.xlu0 %6073 }
 0xbfb   : > { %v6071_v40 = vpop.xlane.xlu1 %6070  ;;  %8024 = vrcp.f32 %v6074_v18 }
 0xbfc   : > { %8026 = vrcp.f32 %v6071_v40 }
 0xbff   : > { %v6077_v41 = vpop.xlane.xlu1 %6076 }
 0xc00   : > { %8028 = vrcp.f32 %v6077_v41 }
 0xc03   : > { %v6083_v42 = vpop.xlane.xlu1 %6082  ;;  %v6080_v43 = vpop.xlane.xlu0 %6079 }
 0xc04   : > { %8030 = vrcp.f32 %v6083_v42 }
 0xc05   : > { %8032 = vrcp.f32 %v6080_v43 }
 0xc07   : > { %v6089_v44 = vpop.xlane.xlu1 %6088  ;;  %v6086_v45 = vpop.xlane.xlu0 %6085 }
 0xc08   : > { %v8025_v29 = vpop.eup %8024  ;;  %8034 = vrcp.f32 %v6089_v44 }
 0xc09   : > { %v8027_v46 = vpop.eup %8026  ;;  %8036 = vrcp.f32 %v6086_v45  ;;  %v6102_v28 = vmul.f32 %v8025_v29, %v8009_v2 }
 0xc0a   : > { %v6101_v47 = vmul.f32 %v8027_v46, %v8011_v3 }
 0xc0b   : > { %v6092_v48 = vpop.xlane.xlu0 %6091  ;;  %7839 = vmatmul.mubr.msk.f32.vlgmr.msra.gmra.mxu0 %vm378_vm2, %v6102_v28  ;;  %v6642_v57 = vpop.permute.xlu1 %6641 }
 0xc0c   : > { %8038 = vrcp.f32 %v6092_v48  ;;  %7834 = vmatmul.mubr.msk.f32.vlgmr.msra.gmra.mxu1 %vm378_vm2, %v6101_v47  ;;  %7847 = vmatpush3.msra.mxu0 %v6338_v37 }
 0xc0d   : > { %v8029_v49 = vpop.eup %8028  ;;  %7842 = vmatpush3.msra.mxu1 %v6262_v36  ;;  %7843 = vmatprep.mubr.msk.f32.mxu1 %vm8050_vm1, %v8049_v12 }
 0xc0e   : > { %7851 = vmatprep.subr.mxu1 %v8049_v12  ;;  %v6103_v50 = vmul.f32 %v8029_v49, %v8013_v14  ;;  %7848 = vmatprep.mubr.msk.f32.mxu0 %vm8050_vm1, %v8049_v12 }
 0xc0f   : > { %7856 = vmatprep.subr.mxu0 %v8049_v12  ;;  %v6566_v54 = vpop.permute.xlu0 %6565 }
 0xc10   : > { %7844 = vmatmul.mubr.msk.f32.vlgmr.msra.gmra.mxu1 %vm378_vm2, %v6103_v50 }
 0xc11   : > { %v8031_v51 = vpop.eup %8030  ;;  %7852 = vmatpush3.msra.mxu1 %v6414_v38  ;;  %7853 = vmatprep.mubr.msk.f32.mxu1 %vm8050_vm1, %v8049_v12 }
 0xc12   : > { %v8033_v52 = vpop.eup %8032  ;;  %7861 = vmatprep.subr.mxu1 %v8049_v12  ;;  %v6105_v16 = vmul.f32 %v8031_v51, %v8015_v25 }
 0xc13   : > { %v6104_v53 = vmul.f32 %v8033_v52, %v8017_v27 }
 0xc14   : > { %7854 = vmatmul.mubr.msk.f32.vlgmr.msra.gmra.mxu1 %vm378_vm2, %v6105_v16 }
 0xc15   : > { %v8035_v20 = vpop.eup %8034  ;;  %7849 = vmatmul.mubr.msk.f32.vlgmr.msra.gmra.mxu0 %vm378_vm2, %v6104_v53  ;;  %7862 = vmatpush3.msra.mxu1 %v6566_v54 }
 0xc16   : > { %v8037_v23 = vpop.eup %8036  ;;  %7857 = vmatpush3.msra.mxu0 %v6490_v39  ;;  %7858 = vmatprep.mubr.msk.f32.mxu0 %vm8050_vm1, %v8049_v12  ;;  %v6107_v55 = vmul.f32 %v8035_v20, %v8019_v17 }
 0xc17   : > { %7863 = vmatprep.mubr.msk.f32.mxu1 %vm8050_vm1, %v8049_v12  ;;  %7866 = vmatprep.subr.mxu0 %v8049_v12  ;;  %v6106_v56 = vmul.f32 %v8037_v23, %v8847_v32 }
 0xc18   : > { %7864 = vmatmul.mubr.msk.f32.vlgmr.msra.gmra.mxu1 %vm378_vm2, %v6107_v55  ;;  %7871 = vmatprep.subr.mxu1 %v8722_v5 }
 0xc19   : > { %v8039_v19 = vpop.eup %8038  ;;  %7859 = vmatmul.mubr.msk.f32.vlgmr.msra.gmra.mxu0 %vm378_vm2, %v6106_v56  ;;  %7872 = vmatpush3.msra.mxu1 %v8722_v5 }
 0xc1a   : > { %7867 = vmatpush3.msra.mxu0 %v6642_v57  ;;  %7868 = vmatprep.mubr.msk.f32.mxu0 %vm8050_vm1, %v8049_v12  ;;  %v6108_v26 = vmul.f32 %v8039_v19, %v8852_v4 }
 0xc1b   : > { %7876 = vmatprep.subr.mxu0 %v8727_v6  ;;  %7881 = vmatprep.subr.mxu1 %v8736_v7 }
 0xc1d   : > { %7869 = vmatmul.mubr.msk.f32.vlgmr.msra.gmra.mxu0 %vm378_vm2, %v6108_v26 }
 0xc1e   : > { %7877 = vmatpush3.msra.mxu0 %v8727_v6 }
 0xc1f   : > { %7886 = vmatprep.subr.mxu0 %v8742_v8 }
 0xccb   : > { %v6257_v58 = vpop.f32.mrf.mxu0 }
 0xccc   : > { %v6181_v59 = vpop.f32.mrf.mxu1  ;;  %6718 = vst.msk [vmem:[#allocation2 + $0x8] sm:$0xff] %vm378_vm2, %v6257_v58 }
 0xccd   : > { %6717 = vst.msk [vmem:[#allocation2] sm:$0xff] %vm378_vm2, %v6181_v59  ;;  %v7840_v5 = vpop.f32.mrf.mxu0 }
 0xcce   : > { %v7835_v12 = vpop.f32.mrf.mxu1 }
 0xcd0   : > { %v6333_v24 = vpop.f32.mrf.mxu1 }
 0xcd1   : > { %6719 = vst.msk [vmem:[#allocation2 + $0x10] sm:$0xff] %vm378_vm2, %v6333_v24 }
 0xcd2   : > { %v7845_v60 = vpop.f32.mrf.mxu1 }
 0xcd4   : > { %v6485_v21 = vpop.f32.mrf.mxu1 }
 0xcd5   : > { %v6409_v22 = vpop.f32.mrf.mxu0  ;;  %6721 = vst.msk [vmem:[#allocation2 + $0x20] sm:$0xff] %vm378_vm2, %v6485_v21 }
 0xcd6   : > { %6720 = vst.msk [vmem:[#allocation2 + $0x18] sm:$0xff] %vm378_vm2, %v6409_v22  ;;  %v7855_v6 = vpop.f32.mrf.mxu1 }
 0xcd7   : > { %v7850_v62 = vpop.f32.mrf.mxu0 }
 0xcd8   : > { %v6637_v63 = vpop.f32.mrf.mxu1 }
 0xcd9   : > { %v6561_v0 = vpop.f32.mrf.mxu0  ;;  %6723 = vst.msk [vmem:[#allocation2 + $0x30] sm:$0xff] %vm378_vm2, %v6637_v63 }
 0xcda   : > { %6722 = vst.msk [vmem:[#allocation2 + $0x28] sm:$0xff] %vm378_vm2, %v6561_v0  ;;  %v7865_v1 = vpop.f32.mrf.mxu1 }
 0xcdb   : > { %v7860_v2 = vpop.f32.mrf.mxu0 }
 0xcdd   : > { %v6713_v3 = vpop.f32.mrf.mxu0  ;;  %v6725_v9 = vld [vmem:[#allocation2] ss:$4 sm:$0xff]  ;;  %v6811_v10 = vld [vmem:[#allocation2 + $0x1] ss:$4 sm:$0xff]  ;;  %v6897_v15 = vld [vmem:[#allocation2 + $0x2] ss:$4 sm:$0xff] }
 0xcde   : > { %6724 = vst.msk [vmem:[#allocation2 + $0x38] sm:$0xff] %vm378_vm2, %v6713_v3  ;;  %7873 = vmatprep.mubr.msk.f32.mxu1 %vm378_vm2, %v6725_v9  ;;  %7878 = vmatprep.mubr.msk.f32.mxu0 %vm378_vm2, %v6811_v10  ;;  %v6983_v25 = vld [vmem:[#allocation2 + $0x3] ss:$4 sm:$0xff] }
 0xcdf   : > { %v7870_v11 = vpop.f32.mrf.mxu0 }
 0xce5   : > { %v6726_v13 = vld [vmem:[#allocation2 + $0x20] ss:$4 sm:$0xff]  ;;  %v6812_v14 = vld [vmem:[#allocation2 + $0x21] ss:$4 sm:$0xff]  ;;  %v6898_v27 = vld [vmem:[#allocation2 + $0x22] ss:$4 sm:$0xff] }
 0xce6   : > { %7874 = vmatmul.mubr.msk.f32.vlgmr.msra.gmra.mxu1 %vm378_vm2, %v6726_v13  ;;  %7879 = vmatmul.mubr.msk.f32.vlgmr.msra.gmra.mxu0 %vm378_vm2, %v6812_v14  ;;  %v6984_v30 = vld [vmem:[#allocation2 + $0x23] ss:$4 sm:$0xff] }
 0xce7   : > { %7882 = vmatpush3.msra.mxu1 %v8736_v7  ;;  %7883 = vmatprep.mubr.msk.f32.mxu1 %vm378_vm2, %v6897_v15 }
 0xce8   : > { %7888 = vmatprep.mubr.msk.f32.mxu0 %vm378_vm2, %v6983_v25  ;;  %7887 = vmatpush3.msra.mxu0 %v8742_v8 }
 0xcea   : > { %7884 = vmatmul.mubr.msk.f32.vlgmr.msra.gmra.mxu1 %vm378_vm2, %v6898_v27  ;;  %7889 = vmatmul.mubr.msk.f32.vlgmr.msra.gmra.mxu0 %vm378_vm2, %v6984_v30 }
 0xda6   : > { %v7875_v31 = vpop.f32.mrf.mxu1  ;;  %v7880_v17 = vpop.f32.mrf.mxu0 }
 0xda7   : > { %v6810_v32 = vadd.f32 %v8812_v61, %v7875_v31 }
 0xda8   : > { %v6800_v7 = vpop.f32.mrf.mxu1  ;;  %v6886_v33 = vpop.f32.mrf.mxu0 }
 0xda9   : > { %v6896_v34 = vadd.f32 %v7880_v17, %v6810_v32  ;;  %v6809_v4 = vadd.f32 %v8812_v61, %v6800_v7 }
 0xdaa   : > { %v7885_v35 = vpop.f32.mrf.mxu1  ;;  %v7890_v36 = vpop.f32.mrf.mxu0 }
 0xdab   : > { %v6895_v8 = vadd.f32 %v6886_v33, %v6809_v4  ;;  %v6982_v37 = vadd.f32 %v7885_v35, %v6896_v34 }
 0xdac   : > { %v6972_v38 = vpop.f32.mrf.mxu1  ;;  %v7058_v40 = vpop.f32.mrf.mxu0 }
 0xdad   : > { %v7068_v39 = vadd.f32 %v7890_v36, %v6982_v37  ;;  %v6981_v18 = vadd.f32 %v6972_v38, %v6895_v8 }
 0xdaf   : > { %7076 = vst.msk [vmem:[%s8425_s27 + $0x38] sm:$0xff] %vm244_vm0, %v7068_v39  ;;  %v7067_v41 = vadd.f32 %v7058_v40, %v6981_v18 }
 0xdb1   : > { %7075 = vst.msk [vmem:[%s8425_s27 + $0x30] sm:$0xff] %vm244_vm0, %v7067_v41 }
 0xdb2 PF: > { %s15_s18 = sadd.s32 1, %s8047_s18  }
 0xdb3   : > { %p12_p4 = scmp.ge.s32.totalorder %s15_s18, 4  }
 0xdb5   :  { %14 = sbr.rel (!%p12_p4) target bundleno = 1 (0x1), region = 77 }

</bundles_post_ra>
